<compile_context>
chip_gen: v6e
topology: v6e:2x2x1
jax: 0.10.0
libtpu: 0.0.40
codegen_flags: <defaults>
</compile_context>

<pallas_src>
import functools

import jax
import jax.numpy as jnp
from jax.experimental import pallas as pl
from jax.experimental.pallas import tpu as pltpu

LATENT_DIM = 32
IN_DIM = 784                       # 28*28; multiple of 8 (valid sublane dim)
HID_DIM = 400
HEAD_DIM = 2 * LATENT_DIM          # fused mu || logvar head = 64

HID_PAD = 512                      # 4 * 128 lanes (fc1 output / fc2 input)
HEAD_PAD = 128                     # lane-dense fused-head width


def _round_up(n, m):
    return (n + m - 1) // m * m


def encoder_kernel(x_ref, w1_ref, b1_ref, w2_ref, b2_ref, out_ref):
    # Cast the activation tile to the weight dtype in-kernel (cheap VPU cast)
    # so the wrapper never materializes a padded/cast copy of x in HBM.
    x = x_ref[...].astype(w1_ref.dtype)
    # fc1 on the MXU with f32 accumulation; bias add + ReLU in f32 on the VPU.
    h1 = jnp.dot(x, w1_ref[...], preferred_element_type=jnp.float32)
    h1 = jnp.maximum(h1 + b1_ref[...], 0.0)
    # Fused fc21||fc22 head.  h1 stays in f32 (exact parity with the reference;
    # this matmul is ~12% of the FLOPs and the kernel has MXU slack on the
    # memory-bound path).  Head zero-padded to 128 lanes -> unmasked stores.
    out = jnp.dot(h1, w2_ref[...].astype(jnp.float32),
                  preferred_element_type=jnp.float32) + b2_ref[...]
    out_ref[...] = out.astype(out_ref.dtype)


def pack_params(w1, b1, w21, b21, w22, b22, compute_dtype=jnp.bfloat16):
    """One-time weight prep: fuse fc21/fc22 and zero-pad to MXU-friendly lanes.

    w*: (in_features, out_features) — transpose of nn.Linear.weight;
    b*: (out_features,).  Padding is exact: zero rows/cols contribute nothing
    and relu(0) = 0.  Biases stay f32 (added to the f32 accumulator in-kernel).
    """
    def _b2d(b):
        return jnp.asarray(b, jnp.float32).reshape(1, -1)

    w1p = jnp.zeros((IN_DIM, HID_PAD), compute_dtype)
    w1p = w1p.at[:, :HID_DIM].set(jnp.asarray(w1).astype(compute_dtype))
    b1p = jnp.zeros((1, HID_PAD), jnp.float32)
    b1p = b1p.at[:, :HID_DIM].set(_b2d(b1))

    w2 = jnp.concatenate([jnp.asarray(w21), jnp.asarray(w22)], axis=1)   # (400, 64)
    b2 = jnp.concatenate([_b2d(b21), _b2d(b22)], axis=1)                 # (1, 64)
    w2p = jnp.zeros((HID_PAD, HEAD_PAD), compute_dtype)
    w2p = w2p.at[:HID_DIM, :HEAD_DIM].set(w2.astype(compute_dtype))
    b2p = jnp.zeros((1, HEAD_PAD), jnp.float32)
    b2p = b2p.at[:, :HEAD_DIM].set(b2)

    return w1p, b1p, w2p, b2p


@functools.partial(jax.jit, static_argnames=("block_b", "out_dtype"))
def encoder_forward(x, w1p, b1p, w2p, b2p, *, block_b=1024, out_dtype=None):
    """Returns (mu, logvar), each (B, LATENT_DIM).

    Output dtype defaults to the weight (compute) dtype so the lane-dense head
    store stays compact (bf16 by default); pass out_dtype=jnp.float32 for f32.
    """
    B, F = x.shape
    assert F == IN_DIM, f"expected (B, {IN_DIM}) input, got {x.shape}"
    compute_dtype = w1p.dtype
    out_dtype = compute_dtype if out_dtype is None else out_dtype

    # --- Batch tiling --------------------------------------------------------
    # Tiles are 16-row aligned (bf16 sublane packing).  Split the batch into as
    # few tiles as block_b allows, sized evenly so tail padding stays small.
    # For large batches force >= 2 grid steps so the "parallel" batch axis can
    # shard across both v7x TensorCores.
    B16 = _round_up(B, 16)
    n_tiles = pl.cdiv(B16, min(_round_up(block_b, 16), B16))
    if B >= 512:
        n_tiles = max(n_tiles, 2)
    bb = _round_up(pl.cdiv(B16, n_tiles), 16)
    B_pad = _round_up(B, bb)
    grid = (B_pad // bb,)

    # Conditional, tail-only batch padding: never pads the feature axis, and
    # performs no copy at all when B already divides the tile.  Padded tail
    # rows produce garbage outputs; they are sliced off below.
    xin = x if B_pad == B else jnp.pad(x, ((0, B_pad - B), (0, 0)))

    in_specs = [
        pl.BlockSpec((bb, IN_DIM), lambda i: (i, 0)),          # x tile (784 = full last dim)
        pl.BlockSpec((IN_DIM, HID_PAD), lambda i: (0, 0)),     # W1   (grid-invariant)
        pl.BlockSpec((1, HID_PAD), lambda i: (0, 0)),          # b1
        pl.BlockSpec((HID_PAD, HEAD_PAD), lambda i: (0, 0)),   # W21 || W22
        pl.BlockSpec((1, HEAD_PAD), lambda i: (0, 0)),         # b21 || b22
    ]
    out_specs = pl.BlockSpec((bb, HEAD_PAD), lambda i: (i, 0))

    # Advisory cost hint so XLA schedules/overlaps the custom call sensibly.
    def _bytes(a):
        return a.size * jnp.dtype(a.dtype).itemsize
    cost = pl.CostEstimate(
        flops=2 * B * (IN_DIM * HID_DIM + HID_DIM * HEAD_DIM),
        transcendentals=0,
        bytes_accessed=(_bytes(xin) + _bytes(w1p) + _bytes(b1p)
                        + _bytes(w2p) + _bytes(b2p)
                        + B_pad * HEAD_PAD * jnp.dtype(out_dtype).itemsize),
    )

    out = pl.pallas_call(
        encoder_kernel,
        out_shape=jax.ShapeDtypeStruct((B_pad, HEAD_PAD), out_dtype),
        grid_spec=pltpu.PrefetchScalarGridSpec(
            num_scalar_prefetch=0,
            grid=grid,
            in_specs=in_specs,
            out_specs=out_specs,
        ),
        compiler_params=pltpu.CompilerParams(
            dimension_semantics=("parallel",),
            # Explicit scoped-VMEM budget so bb up to ~1024 also compiles on
            # v5e (16 MiB scoped default); well under every chip's physical VMEM.
            vmem_limit_bytes=48 * 1024 * 1024,
        ),
        cost_estimate=cost,
    )(xin, w1p, b1p, w2p, b2p)

    mu = out[:B, :LATENT_DIM]
    logvar = out[:B, LATENT_DIM:HEAD_DIM]
    return mu, logvar


def init_params(key):
    """Deterministic init mimicking nn.Linear's uniform(-1/sqrt(in), 1/sqrt(in))."""
    ks = jax.random.split(key, 6)

    def lin(kw, kb, fan_in, fan_out):
        bound = 1.0 / jnp.sqrt(fan_in)
        w = jax.random.uniform(kw, (fan_in, fan_out), jnp.float32, -bound, bound)
        b = jax.random.uniform(kb, (fan_out,), jnp.float32, -bound, bound)
        return w, b

    w1, b1 = lin(ks[0], ks[1], IN_DIM, HID_DIM)
    w21, b21 = lin(ks[2], ks[3], HID_DIM, LATENT_DIM)
    w22, b22 = lin(ks[4], ks[5], HID_DIM, LATENT_DIM)
    return w1, b1, w21, b21, w22, b22


def reference_forward(x, w1, b1, w21, b21, w22, b22):
    h1 = jnp.maximum(x @ w1 + b1, 0.0)
    return h1 @ w21 + b21, h1 @ w22 + b22


if __name__ == "__main__":
    key = jax.random.PRNGKey(0)
    kx, kp = jax.random.split(key)

    raw = init_params(kp)

    # --- small batch, f32 weights: head fusion + padding must be exact -------
    B = 16
    x = jax.random.normal(kx, (B, IN_DIM), jnp.float32)
    mu_ref, lv_ref = reference_forward(x, *raw)

    p32 = pack_params(*raw, compute_dtype=jnp.float32)
    mu32, lv32 = encoder_forward(x, *p32)
    jax.block_until_ready((mu32, lv32))
    assert mu32.shape == (B, LATENT_DIM) and lv32.shape == (B, LATENT_DIM)
    assert mu32.dtype == jnp.float32
    assert jnp.allclose(mu32, mu_ref, atol=1e-4, rtol=1e-4)
    assert jnp.allclose(lv32, lv_ref, atol=1e-4, rtol=1e-4)

    # --- default bf16 weights (f32 accumulation, f32 h1): looser tolerance ---
    pbf = pack_params(*raw)                      # bf16 weights, bf16 output
    mubf, lvbf = encoder_forward(x, *pbf)
    jax.block_until_ready((mubf, lvbf))
    assert mubf.dtype == jnp.bfloat16
    assert jnp.allclose(mubf.astype(jnp.float32), mu_ref, atol=5e-2, rtol=5e-2)
    assert jnp.allclose(lvbf.astype(jnp.float32), lv_ref, atol=5e-2, rtol=5e-2)

    # --- ragged batch + multi-step grid (tail-only padding path) -------------
    B2 = 29
    x2 = jax.random.normal(kx, (B2, IN_DIM), jnp.float32)
    mu2, lv2 = encoder_forward(x2, *p32, block_b=16)   # grid of 2, padded tail
    jax.block_until_ready((mu2, lv2))
    mu2_ref, lv2_ref = reference_forward(x2, *raw)
    assert mu2.shape == (B2, LATENT_DIM) and lv2.shape == (B2, LATENT_DIM)
    assert jnp.allclose(mu2, mu2_ref, atol=1e-4, rtol=1e-4)
    assert jnp.allclose(lv2, lv2_ref, atol=1e-4, rtol=1e-4)

    print("KERNEL_OK")
</pallas_src>

<mosaic_0001>
module attributes {stable_mosaic.version = 11 : i64} {
  func.func @encoder_kernel(%arg0: i32, %arg1: memref<16x784xf32, #tpu.memory_space<vmem>>, %arg2: memref<784x512xf32, #tpu.memory_space<vmem>>, %arg3: memref<1x512xf32, #tpu.memory_space<vmem>>, %arg4: memref<512x128xf32, #tpu.memory_space<vmem>>, %arg5: memref<1x128xf32, #tpu.memory_space<vmem>>, %arg6: memref<16x128xf32, #tpu.memory_space<vmem>>) attributes {dimension_semantics = [#tpu.dimension_semantics<parallel>], iteration_bounds = array<i64: 1>, scalar_prefetch = 0 : i64, scratch_operands = 0 : i64, tpu.core_type = #tpu.core_type<tc>, window_params = [{transform_indices = @transform_0, window_bounds = array<i64: 16, 784>}, {pipeline_mode = #tpu.pipeline_mode<synchronous>, transform_indices = @transform_1, window_bounds = array<i64: 784, 512>}, {pipeline_mode = #tpu.pipeline_mode<synchronous>, transform_indices = @transform_2, window_bounds = array<i64: 1, 512>}, {pipeline_mode = #tpu.pipeline_mode<synchronous>, transform_indices = @transform_3, window_bounds = array<i64: 512, 128>}, {pipeline_mode = #tpu.pipeline_mode<synchronous>, transform_indices = @transform_4, window_bounds = array<i64: 1, 128>}, {transform_indices = @transform_5, window_bounds = array<i64: 16, 128>}]} {
    %c0 = arith.constant 0 : index
    %c0_0 = arith.constant 0 : index
    %0 = vector.load %arg1[%c0, %c0_0] : memref<16x784xf32, #tpu.memory_space<vmem>>, vector<16x784xf32>
    %c0_1 = arith.constant 0 : index
    %c0_2 = arith.constant 0 : index
    %1 = vector.load %arg2[%c0_1, %c0_2] : memref<784x512xf32, #tpu.memory_space<vmem>>, vector<784x512xf32>
    %cst = arith.constant dense<0.000000e+00> : vector<16x512xf32>
    %2 = tpu.matmul %0, %1, %cst {dimension_numbers = #tpu.dot_dimension_numbers<[1], [0], [0], [1], [0, 0, 1, 1], [], []>} : vector<16x784xf32>, vector<784x512xf32>, vector<16x512xf32> -> vector<16x512xf32>
    %c0_3 = arith.constant 0 : index
    %c0_4 = arith.constant 0 : index
    %3 = vector.load %arg3[%c0_3, %c0_4] : memref<1x512xf32, #tpu.memory_space<vmem>>, vector<1x512xf32>
    %4 = vector.broadcast %3 : vector<1x512xf32> to vector<16x512xf32>
    %5 = arith.addf %2, %4 : vector<16x512xf32>
    %cst_5 = arith.constant 0.000000e+00 : f32
    %6 = vector.broadcast %cst_5 : f32 to vector<16x512xf32>
    %7 = arith.maximumf %5, %6 : vector<16x512xf32>
    %c0_6 = arith.constant 0 : index
    %c0_7 = arith.constant 0 : index
    %8 = vector.load %arg4[%c0_6, %c0_7] : memref<512x128xf32, #tpu.memory_space<vmem>>, vector<512x128xf32>
    %cst_8 = arith.constant dense<0.000000e+00> : vector<16x128xf32>
    %9 = tpu.matmul %7, %8, %cst_8 {dimension_numbers = #tpu.dot_dimension_numbers<[1], [0], [0], [1], [0, 0, 1, 1], [], []>} : vector<16x512xf32>, vector<512x128xf32>, vector<16x128xf32> -> vector<16x128xf32>
    %c0_9 = arith.constant 0 : index
    %c0_10 = arith.constant 0 : index
    %10 = vector.load %arg5[%c0_9, %c0_10] : memref<1x128xf32, #tpu.memory_space<vmem>>, vector<1x128xf32>
    %11 = vector.broadcast %10 : vector<1x128xf32> to vector<16x128xf32>
    %12 = arith.addf %9, %11 : vector<16x128xf32>
    %c0_11 = arith.constant 0 : index
    %c0_12 = arith.constant 0 : index
    %13 = vector.load %arg6[%c0_11, %c0_12] : memref<16x128xf32, #tpu.memory_space<vmem>>, vector<16x128xf32>
    tpu.vector_store %arg6[%c0_11, %c0_12], %12 {strides = array<i32>} : memref<16x128xf32, #tpu.memory_space<vmem>>, vector<16x128xf32>,
    return
  }
  func.func @transform_0(%arg0: i32) -> (i32, i32) {
    %c0_i32 = arith.constant 0 : i32
    %c0_i32_0 = arith.constant 0 : i32
    return %arg0, %c0_i32 : i32, i32
  }
  func.func @transform_1(%arg0: i32) -> (i32, i32) {
    %c0_i32 = arith.constant 0 : i32
    %c0_i32_0 = arith.constant 0 : i32
    %c0_i32_1 = arith.constant 0 : i32
    return %c0_i32, %c0_i32_0 : i32, i32
  }
  func.func @transform_2(%arg0: i32) -> (i32, i32) {
    %c0_i32 = arith.constant 0 : i32
    %c0_i32_0 = arith.constant 0 : i32
    %c0_i32_1 = arith.constant 0 : i32
    return %c0_i32, %c0_i32_0 : i32, i32
  }
  func.func @transform_3(%arg0: i32) -> (i32, i32) {
    %c0_i32 = arith.constant 0 : i32
    %c0_i32_0 = arith.constant 0 : i32
    %c0_i32_1 = arith.constant 0 : i32
    return %c0_i32, %c0_i32_0 : i32, i32
  }
  func.func @transform_4(%arg0: i32) -> (i32, i32) {
    %c0_i32 = arith.constant 0 : i32
    %c0_i32_0 = arith.constant 0 : i32
    %c0_i32_1 = arith.constant 0 : i32
    return %c0_i32, %c0_i32_0 : i32, i32
  }
  func.func @transform_5(%arg0: i32) -> (i32, i32) {
    %c0_i32 = arith.constant 0 : i32
    %c0_i32_0 = arith.constant 0 : i32
    return %arg0, %c0_i32 : i32, i32
  }
}

</mosaic_0001>

<bundles_post_ra>
// kernel: encoder_forward.1
= control target key start
LH: loop header
LB: loop body
LE: loop exit
PB: predicated region body
PF: predicated region fallthrough
CT: control target
= control target key end

     0   :  { %10 = vsyncpa [#allocation3], 0  ;;  %s1678_s0 = inlined_call_operand.hbm [shape: f32[16,784], index: 0, kind: input, shape index: {}]   ;;  %s1679_s1 = inlined_call_operand.hbm [shape: f32[784,512], index: 1, kind: input, shape index: {}]   ;;  %s1680_s2 = inlined_call_operand.hbm [shape: f32[1,512], index: 2, kind: input, shape index: {}]   ;;  %s1681_s3 = inlined_call_operand.hbm [shape: f32[512,128], index: 3, kind: input, shape index: {}]   ;;  %s1682_s4 = inlined_call_operand.hbm [shape: f32[1,128], index: 4, kind: input, shape index: {}]   ;;  %s1683_s5 = inlined_call_operand.vmem [shape: f32[16,128], index: 5, kind: output, shape index: {}]  }
   0x1   :  { %11 = vsyncpa [#allocation5], 0 }
   0x2   :  { %12 = vsyncpa [#allocation8], 0  ;;  %s1579_s18 = smov [#allocation4]  }
   0x3   :  { %s30_s19 = sshll.u32 %s1579_s18, 4  ;;  %s31_s19 = int_to_ptr.vmem [resolvable:$true] %s30_s19 }
   0x4   :  { %s1481_s20 = scalar_lea.vmem %s31_s19, 50176  ;;  %p1486_p1 = scmp.lt.s32.totalorder %s31_s19, %s31_s19 }
   0x5   :  { %p1482_p0 = scmp.ne.s32.totalorder %s31_s19, %s1481_s20  ;;  %p1487_p2 = scmp.lt.s32.totalorder %s1481_s20, %s1481_s20 }
   0x7   :  { %p1488_p3 = por %p1487_p2, %p1486_p1 }
   0x9   :  { %p1489_p4 = pnand %p1488_p3, %p1482_p0 }
   0xb   :  { %1492 = shalt.err (!%p1489_p4)
}
   0xc   :  { %s1580_s21 = smov 512   ;;  %s1581_s22 = smov 32  }
   0xd   :  { %36 = dma.hbm_to_vmem [thread:$0]  %s1679_s1, 50176, %s31_s19, [#allocation5], %s1580_s21, %s1580_s21, %s1581_s22  }
   0xe   :  { %s1582_s25 = smov [#allocation7]  }
   0xf   :  { %s52_s26 = sshll.u32 %s1582_s25, 4  ;;  %s53_s26 = int_to_ptr.vmem [resolvable:$true] %s52_s26 }
  0x10   :  { %s1501_s27 = scalar_lea.vmem %s53_s26, 8192  ;;  %p1506_p6 = scmp.lt.s32.totalorder %s53_s26, %s53_s26 }
  0x11   :  { %p1502_p5 = scmp.ne.s32.totalorder %s53_s26, %s1501_s27  ;;  %p1507_p7 = scmp.lt.s32.totalorder %s1501_s27, %s1501_s27 }
  0x13   :  { %p1508_p8 = por %p1507_p7, %p1506_p6 }
  0x15   :  { %p1509_p9 = pnand %p1508_p8, %p1502_p5 }
  0x17   :  { %1512 = shalt.err (!%p1509_p9)
}
  0x18   :  { %s1583_s28 = smov 128   ;;  %s1584_s29 = smov 8  }
  0x19   :  { %58 = dma.hbm_to_vmem [thread:$0]  %s1681_s3, 8192, %s53_s26, [#allocation8], %s1583_s28, %s1583_s28, %s1584_s29  }
  0x1a   :  { %s1585_s7 = smov [#allocation2]  }
  0x1b   :  { %s18_s8 = sshll.u32 %s1585_s7, 4  ;;  %s19_s8 = int_to_ptr.vmem [resolvable:$true] %s18_s8 }
  0x1c   :  { %s1521_s1 = scalar_lea.vmem %s19_s8, 1792  ;;  %p1526_p11 = scmp.lt.s32.totalorder %s19_s8, %s19_s8 }
  0x1d   :  { %p1522_p10 = scmp.ne.s32.totalorder %s19_s8, %s1521_s1  ;;  %p1527_p12 = scmp.lt.s32.totalorder %s1521_s1, %s1521_s1 }
  0x1f   :  { %p1528_p13 = por %p1527_p12, %p1526_p11 }
  0x21   :  { %p1529_p0 = pnand %p1528_p13, %p1522_p10 }
  0x23   :  { %1532 = shalt.err (!%p1529_p0)
}
  0x24   :  { %s1586_s9 = smov 896   ;;  %s1587_s10 = smov 56  }
  0x25   :  { %24 = dma.hbm_to_vmem [thread:$0]  %s1678_s0, 1792, %s19_s8, [#allocation3], %s1586_s9, %s1586_s9, %s1587_s10  }
  0x26   :  { %s1588_s13 = smov [#allocation6]   ;;  %s1589_s3 = smov [#allocation9]  }
  0x27   :  { %s43_s14 = sshll.u32 %s1588_s13, 4  ;;  %s65_s15 = sshll.u32 %s1589_s3, 4  ;;  %s44_s14 = int_to_ptr.vmem [resolvable:$true] %s43_s14  ;;  %s66_s15 = int_to_ptr.vmem [resolvable:$true] %s65_s15 }
  0x28   :  { %s1541_s16 = scalar_lea.vmem %s44_s14, 64  ;;  %p1546_p2 = scmp.lt.s32.totalorder %s44_s14, %s44_s14 }
  0x29   :  { %p1542_p1 = scmp.ne.s32.totalorder %s44_s14, %s1541_s16  ;;  %p1547_p3 = scmp.lt.s32.totalorder %s1541_s16, %s1541_s16 }
  0x2b   :  { %p1548_p4 = por %p1547_p3, %p1546_p2 }
  0x2d   :  { %p1549_p5 = pnand %p1548_p4, %p1542_p1 }
  0x2f   :  { %1552 = shalt.err (!%p1549_p5)
}
  0x30   :  { %46 = dma.hbm_to_vmem [thread:$0]  %s1680_s2, 64, %s44_s14, [#allocation5]  }
  0x31   :  { %s1561_s19 = scalar_lea.vmem %s66_s15, 16  ;;  %s1565_s0 = scalar_lea.vmem %s66_s15, 32 }
  0x32   :  { %p1562_p6 = scmp.ne.s32.totalorder %s66_s15, %s1561_s19  ;;  %p1566_p7 = scmp.lt.s32.totalorder %s66_s15, %s66_s15 }
  0x33   :  { %p1567_p8 = scmp.lt.s32.totalorder %s1565_s0, %s1561_s19 }
  0x35   :  { %p1568_p9 = por %p1567_p8, %p1566_p7 }
  0x37   :  { %p1569_p10 = pnand %p1568_p9, %p1562_p6 }
  0x39   :  { %1572 = shalt.err (!%p1569_p10)
}
  0x3a   :  { %68 = dma.hbm_to_vmem [thread:$0]  %s1682_s4, 16, %s66_s15, [#allocation8]  }
  0x3b   :  { %1573 = dma.done.wait [#allocation3], 1792  }
  0x3c   :  { %1574 = vsyncadd [#allocation3], 4294965504 }
  0x3d   :  { %1575 = dma.done.wait [#allocation5], 50240  }
  0x3e   :  { %1576 = vsyncadd [#allocation5], 4294917056 }
  0x3f   :  { %1577 = dma.done.wait [#allocation8], 8208  }
  0x40   :  { %1578 = vsyncadd [#allocation8], 4294959088  ;;  %v159_v0 = vld [vmem:[#allocation4 + $0x1e8] sm:$0xff]  ;;  %v158_v2 = vld [vmem:[#allocation4 + $0x1e0] sm:$0xff]  ;;  %vm512_vm0 = vcmask 130048  }
  0x41   :  { %v287_v1 = vld [vmem:[#allocation4 + $0x5e8] sm:$0xff]  ;;  %519 = vmatprep.subr.mxu0 %v159_v0  ;;  %v286_v3 = vld [vmem:[#allocation4 + $0x5e0] sm:$0xff] }
  0x42   :  { %596 = vmatprep.subr.mxu1 %v287_v1  ;;  %v155_v4 = vld [vmem:[#allocation4 + $0x1c8] sm:$0xff]  ;;  %520 = vmatpush1.msra.mxu0 %v158_v2  ;;  %v154_v6 = vld [vmem:[#allocation4 + $0x1c0] sm:$0xff] }
  0x43   :  { %v283_v5 = vld [vmem:[#allocation4 + $0x5c8] sm:$0xff]  ;;  %597 = vmatpush1.msra.mxu1 %v286_v3  ;;  %v282_v7 = vld [vmem:[#allocation4 + $0x5c0] sm:$0xff]  ;;  %521 = vmatprep.subr.mxu0 %v155_v4 }
  0x44   :  { %v151_v8 = vld [vmem:[#allocation4 + $0x1a8] sm:$0xff]  ;;  %598 = vmatprep.subr.mxu1 %v283_v5  ;;  %v150_v10 = vld [vmem:[#allocation4 + $0x1a0] sm:$0xff]  ;;  %522 = vmatpush1.msra.mxu0 %v154_v6 }
  0x45   :  { %v279_v9 = vld [vmem:[#allocation4 + $0x5a8] sm:$0xff]  ;;  %v278_v11 = vld [vmem:[#allocation4 + $0x5a0] sm:$0xff]  ;;  %599 = vmatpush1.msra.mxu1 %v282_v7  ;;  %523 = vmatprep.subr.mxu0 %v151_v8 }
  0x46   :  { %v147_v12 = vld [vmem:[#allocation4 + $0x188] sm:$0xff]  ;;  %600 = vmatprep.subr.mxu1 %v279_v9  ;;  %v146_v14 = vld [vmem:[#allocation4 + $0x180] sm:$0xff]  ;;  %524 = vmatpush1.msra.mxu0 %v150_v10 }
  0x47   :  { %v275_v13 = vld [vmem:[#allocation4 + $0x588] sm:$0xff]  ;;  %v274_v15 = vld [vmem:[#allocation4 + $0x580] sm:$0xff]  ;;  %601 = vmatpush1.msra.mxu1 %v278_v11  ;;  %525 = vmatprep.subr.mxu0 %v147_v12 }
  0x48   :  { %v143_v16 = vld [vmem:[#allocation4 + $0x168] sm:$0xff]  ;;  %602 = vmatprep.subr.mxu1 %v275_v13  ;;  %v142_v18 = vld [vmem:[#allocation4 + $0x160] sm:$0xff]  ;;  %526 = vmatpush1.msra.mxu0 %v146_v14 }
  0x49   :  { %v271_v17 = vld [vmem:[#allocation4 + $0x568] sm:$0xff]  ;;  %v270_v19 = vld [vmem:[#allocation4 + $0x560] sm:$0xff]  ;;  %603 = vmatpush1.msra.mxu1 %v274_v15  ;;  %527 = vmatprep.subr.mxu0 %v143_v16 }
  0x4a   :  { %v139_v20 = vld [vmem:[#allocation4 + $0x148] sm:$0xff]  ;;  %604 = vmatprep.subr.mxu1 %v271_v17  ;;  %v138_v22 = vld [vmem:[#allocation4 + $0x140] sm:$0xff]  ;;  %528 = vmatpush1.msra.mxu0 %v142_v18 }
  0x4b   :  { %v267_v21 = vld [vmem:[#allocation4 + $0x548] sm:$0xff]  ;;  %v266_v23 = vld [vmem:[#allocation4 + $0x540] sm:$0xff]  ;;  %605 = vmatpush1.msra.mxu1 %v270_v19  ;;  %529 = vmatprep.subr.mxu0 %v139_v20 }
  0x4c   :  { %v135_v24 = vld [vmem:[#allocation4 + $0x128] sm:$0xff]  ;;  %606 = vmatprep.subr.mxu1 %v267_v21  ;;  %v134_v26 = vld [vmem:[#allocation4 + $0x120] sm:$0xff]  ;;  %530 = vmatpush1.msra.mxu0 %v138_v22 }
  0x4d   :  { %v263_v25 = vld [vmem:[#allocation4 + $0x528] sm:$0xff]  ;;  %v262_v27 = vld [vmem:[#allocation4 + $0x520] sm:$0xff]  ;;  %607 = vmatpush1.msra.mxu1 %v266_v23  ;;  %531 = vmatprep.subr.mxu0 %v135_v24 }
  0x4e   :  { %v131_v28 = vld [vmem:[#allocation4 + $0x108] sm:$0xff]  ;;  %608 = vmatprep.subr.mxu1 %v263_v25  ;;  %v130_v30 = vld [vmem:[#allocation4 + $0x100] sm:$0xff]  ;;  %532 = vmatpush1.msra.mxu0 %v134_v26 }
  0x4f   :  { %v259_v29 = vld [vmem:[#allocation4 + $0x508] sm:$0xff]  ;;  %v258_v31 = vld [vmem:[#allocation4 + $0x500] sm:$0xff]  ;;  %609 = vmatpush1.msra.mxu1 %v262_v27  ;;  %533 = vmatprep.subr.mxu0 %v131_v28 }
  0x50   :  { %v127_v32 = vld [vmem:[#allocation4 + $0xe8] sm:$0xff]  ;;  %610 = vmatprep.subr.mxu1 %v259_v29  ;;  %v126_v34 = vld [vmem:[#allocation4 + $0xe0] sm:$0xff]  ;;  %534 = vmatpush1.msra.mxu0 %v130_v30 }
  0x51   :  { %v255_v33 = vld [vmem:[#allocation4 + $0x4e8] sm:$0xff]  ;;  %v254_v35 = vld [vmem:[#allocation4 + $0x4e0] sm:$0xff]  ;;  %611 = vmatpush1.msra.mxu1 %v258_v31  ;;  %535 = vmatprep.subr.mxu0 %v127_v32 }
  0x52   :  { %v123_v36 = vld [vmem:[#allocation4 + $0xc8] sm:$0xff]  ;;  %612 = vmatprep.subr.mxu1 %v255_v33  ;;  %v122_v38 = vld [vmem:[#allocation4 + $0xc0] sm:$0xff]  ;;  %536 = vmatpush1.msra.mxu0 %v126_v34 }
  0x53   :  { %v251_v37 = vld [vmem:[#allocation4 + $0x4c8] sm:$0xff]  ;;  %v250_v39 = vld [vmem:[#allocation4 + $0x4c0] sm:$0xff]  ;;  %613 = vmatpush1.msra.mxu1 %v254_v35  ;;  %537 = vmatprep.subr.mxu0 %v123_v36 }
  0x54   :  { %v119_v40 = vld [vmem:[#allocation4 + $0xa8] sm:$0xff]  ;;  %614 = vmatprep.subr.mxu1 %v251_v37  ;;  %v118_v42 = vld [vmem:[#allocation4 + $0xa0] sm:$0xff]  ;;  %538 = vmatpush1.msra.mxu0 %v122_v38 }
  0x55   :  { %v247_v41 = vld [vmem:[#allocation4 + $0x4a8] sm:$0xff]  ;;  %v246_v43 = vld [vmem:[#allocation4 + $0x4a0] sm:$0xff]  ;;  %615 = vmatpush1.msra.mxu1 %v250_v39  ;;  %539 = vmatprep.subr.mxu0 %v119_v40 }
  0x56   :  { %v115_v44 = vld [vmem:[#allocation4 + $0x88] sm:$0xff]  ;;  %616 = vmatprep.subr.mxu1 %v247_v41  ;;  %v114_v46 = vld [vmem:[#allocation4 + $0x80] sm:$0xff]  ;;  %540 = vmatpush1.msra.mxu0 %v118_v42 }
  0x57   :  { %v243_v45 = vld [vmem:[#allocation4 + $0x488] sm:$0xff]  ;;  %v242_v47 = vld [vmem:[#allocation4 + $0x480] sm:$0xff]  ;;  %617 = vmatpush1.msra.mxu1 %v246_v43  ;;  %541 = vmatprep.subr.mxu0 %v115_v44 }
  0x58   :  { %v111_v48 = vld [vmem:[#allocation4 + $0x68] sm:$0xff]  ;;  %618 = vmatprep.subr.mxu1 %v243_v45  ;;  %v110_v50 = vld [vmem:[#allocation4 + $0x60] sm:$0xff]  ;;  %542 = vmatpush1.msra.mxu0 %v114_v46 }
  0x59   :  { %v239_v49 = vld [vmem:[#allocation4 + $0x468] sm:$0xff]  ;;  %v238_v51 = vld [vmem:[#allocation4 + $0x460] sm:$0xff]  ;;  %619 = vmatpush1.msra.mxu1 %v242_v47  ;;  %543 = vmatprep.subr.mxu0 %v111_v48 }
  0x5a   :  { %v107_v52 = vld [vmem:[#allocation4 + $0x48] sm:$0xff]  ;;  %620 = vmatprep.subr.mxu1 %v239_v49  ;;  %v106_v54 = vld [vmem:[#allocation4 + $0x40] sm:$0xff]  ;;  %544 = vmatpush1.msra.mxu0 %v110_v50 }
  0x5b   :  { %v235_v53 = vld [vmem:[#allocation4 + $0x448] sm:$0xff]  ;;  %v234_v55 = vld [vmem:[#allocation4 + $0x440] sm:$0xff]  ;;  %621 = vmatpush1.msra.mxu1 %v238_v51  ;;  %545 = vmatprep.subr.mxu0 %v107_v52 }
  0x5c   :  { %v103_v56 = vld [vmem:[#allocation4 + $0x28] sm:$0xff]  ;;  %622 = vmatprep.subr.mxu1 %v235_v53  ;;  %v102_v58 = vld [vmem:[#allocation4 + $0x20] sm:$0xff]  ;;  %546 = vmatpush1.msra.mxu0 %v106_v54 }
  0x5d   :  { %v231_v57 = vld [vmem:[#allocation4 + $0x428] sm:$0xff]  ;;  %v230_v59 = vld [vmem:[#allocation4 + $0x420] sm:$0xff]  ;;  %623 = vmatpush1.msra.mxu1 %v234_v55  ;;  %547 = vmatprep.subr.mxu0 %v103_v56 }
  0x5e   :  { %v99_v60 = vld [vmem:[#allocation4 + $0x8] sm:$0xff]  ;;  %624 = vmatprep.subr.mxu1 %v231_v57  ;;  %v98_v62 = vld [vmem:[#allocation4] sm:$0xff]  ;;  %548 = vmatpush1.msra.mxu0 %v102_v58 }
  0x5f   :  { %v227_v61 = vld [vmem:[#allocation4 + $0x408] sm:$0xff]  ;;  %v226_v63 = vld [vmem:[#allocation4 + $0x400] sm:$0xff]  ;;  %625 = vmatpush1.msra.mxu1 %v230_v59  ;;  %549 = vmatprep.subr.mxu0 %v99_v60 }
  0x60   :  { %v223_v0 = vld [vmem:[#allocation4 + $0x3e8] sm:$0xff]  ;;  %626 = vmatprep.subr.mxu1 %v227_v61  ;;  %v222_v2 = vld [vmem:[#allocation4 + $0x3e0] sm:$0xff]  ;;  %550 = vmatpush1.msra.mxu0 %v98_v62 }
  0x61   :  { %v351_v1 = vld [vmem:[#allocation4 + $0x7e8] sm:$0xff]  ;;  %v350_v3 = vld [vmem:[#allocation4 + $0x7e0] sm:$0xff]  ;;  %627 = vmatpush1.msra.mxu1 %v226_v63  ;;  %551 = vmatprep.subr.mxu0 %v223_v0  ;;  %v1636_v63 = vld [vmem:[#allocation2 + $0x8] sm:$0xff] }
  0x62   :  { %v219_v4 = vld [vmem:[#allocation4 + $0x3c8] sm:$0xff]  ;;  %628 = vmatprep.subr.mxu1 %v351_v1  ;;  %v218_v6 = vld [vmem:[#allocation4 + $0x3c0] sm:$0xff]  ;;  %552 = vmatpush2.msra.mxu0 %v222_v2  ;;  %v1638_v2 = vld [vmem:[#allocation2] sm:$0xff] }
  0x63   :  { %v347_v5 = vld [vmem:[#allocation4 + $0x7c8] sm:$0xff]  ;;  %v346_v7 = vld [vmem:[#allocation4 + $0x7c0] sm:$0xff]  ;;  %629 = vmatpush2.msra.mxu1 %v350_v3  ;;  %553 = vmatprep.subr.mxu0 %v219_v4 }
  0x64   :  { %v215_v8 = vld [vmem:[#allocation4 + $0x3a8] sm:$0xff]  ;;  %630 = vmatprep.subr.mxu1 %v347_v5  ;;  %v214_v10 = vld [vmem:[#allocation4 + $0x3a0] sm:$0xff]  ;;  %554 = vmatpush2.msra.mxu0 %v218_v6 }
  0x65   :  { %v343_v9 = vld [vmem:[#allocation4 + $0x7a8] sm:$0xff]  ;;  %v342_v11 = vld [vmem:[#allocation4 + $0x7a0] sm:$0xff]  ;;  %631 = vmatpush2.msra.mxu1 %v346_v7  ;;  %555 = vmatprep.subr.mxu0 %v215_v8 }
  0x66   :  { %v211_v12 = vld [vmem:[#allocation4 + $0x388] sm:$0xff]  ;;  %632 = vmatprep.subr.mxu1 %v343_v9  ;;  %v210_v14 = vld [vmem:[#allocation4 + $0x380] sm:$0xff]  ;;  %556 = vmatpush2.msra.mxu0 %v214_v10  ;;  %v92_v9 = vld [vmem:[#allocation2 + $0x40] sm:$0xff] }
  0x67   :  { %v339_v13 = vld [vmem:[#allocation4 + $0x788] sm:$0xff]  ;;  %v338_v15 = vld [vmem:[#allocation4 + $0x780] sm:$0xff]  ;;  %633 = vmatpush2.msra.mxu1 %v342_v11  ;;  %557 = vmatprep.subr.mxu0 %v211_v12 }
  0x68   :  { %v207_v16 = vld [vmem:[#allocation4 + $0x368] sm:$0xff]  ;;  %634 = vmatprep.subr.mxu1 %v339_v13  ;;  %v206_v18 = vld [vmem:[#allocation4 + $0x360] sm:$0xff]  ;;  %558 = vmatpush2.msra.mxu0 %v210_v14  ;;  %v93_v13 = vld [vmem:[#allocation2 + $0x48] sm:$0xff] }
  0x69   :  { %v335_v17 = vld [vmem:[#allocation4 + $0x768] sm:$0xff]  ;;  %v334_v19 = vld [vmem:[#allocation4 + $0x760] sm:$0xff]  ;;  %635 = vmatpush2.msra.mxu1 %v338_v15  ;;  %559 = vmatprep.subr.mxu0 %v207_v16 }
  0x6a   :  { %v203_v20 = vld [vmem:[#allocation4 + $0x348] sm:$0xff]  ;;  %636 = vmatprep.subr.mxu1 %v335_v17  ;;  %v202_v22 = vld [vmem:[#allocation4 + $0x340] sm:$0xff]  ;;  %560 = vmatpush2.msra.mxu0 %v206_v18 }
  0x6b   :  { %v331_v21 = vld [vmem:[#allocation4 + $0x748] sm:$0xff]  ;;  %v330_v23 = vld [vmem:[#allocation4 + $0x740] sm:$0xff]  ;;  %637 = vmatpush2.msra.mxu1 %v334_v19  ;;  %561 = vmatprep.subr.mxu0 %v203_v20  ;;  %v161_v20 = vld [vmem:[#allocation4 + $0x1f8] sm:$0xff] }
  0x6c   :  { %v199_v24 = vld [vmem:[#allocation4 + $0x328] sm:$0xff]  ;;  %638 = vmatprep.subr.mxu1 %v331_v21  ;;  %v198_v26 = vld [vmem:[#allocation4 + $0x320] sm:$0xff]  ;;  %562 = vmatpush2.msra.mxu0 %v202_v22 }
  0x6d   :  { %v327_v25 = vld [vmem:[#allocation4 + $0x728] sm:$0xff]  ;;  %v326_v27 = vld [vmem:[#allocation4 + $0x720] sm:$0xff]  ;;  %639 = vmatpush2.msra.mxu1 %v330_v23  ;;  %563 = vmatprep.subr.mxu0 %v199_v24  ;;  %v1590_v23 = vmov 0.0   ;;  %v160_v24 = vld [vmem:[#allocation4 + $0x1f0] sm:$0xff] }
  0x6e   :  { %v195_v28 = vld [vmem:[#allocation4 + $0x308] sm:$0xff]  ;;  %640 = vmatprep.subr.mxu1 %v327_v25  ;;  %v194_v30 = vld [vmem:[#allocation4 + $0x300] sm:$0xff]  ;;  %564 = vmatpush2.msra.mxu0 %v198_v26  ;;  %v157_v26 = vld [vmem:[#allocation4 + $0x1d8] sm:$0xff] }
  0x6f   :  { %v323_v29 = vld [vmem:[#allocation4 + $0x708] sm:$0xff]  ;;  %v322_v31 = vld [vmem:[#allocation4 + $0x700] sm:$0xff]  ;;  %641 = vmatpush2.msra.mxu1 %v326_v27  ;;  %565 = vmatprep.subr.mxu0 %v195_v28  ;;  %v156_v28 = vld [vmem:[#allocation4 + $0x1d0] sm:$0xff] }
  0x70   :  { %v191_v32 = vld [vmem:[#allocation4 + $0x2e8] sm:$0xff]  ;;  %642 = vmatprep.subr.mxu1 %v323_v29  ;;  %v190_v34 = vld [vmem:[#allocation4 + $0x2e0] sm:$0xff]  ;;  %566 = vmatpush2.msra.mxu0 %v194_v30  ;;  %v153_v30 = vld [vmem:[#allocation4 + $0x1b8] sm:$0xff] }
  0x71   :  { %v319_v33 = vld [vmem:[#allocation4 + $0x6e8] sm:$0xff]  ;;  %v318_v35 = vld [vmem:[#allocation4 + $0x6e0] sm:$0xff]  ;;  %643 = vmatpush2.msra.mxu1 %v322_v31  ;;  %567 = vmatprep.subr.mxu0 %v191_v32  ;;  %v152_v32 = vld [vmem:[#allocation4 + $0x1b0] sm:$0xff] }
  0x72   :  { %v187_v36 = vld [vmem:[#allocation4 + $0x2c8] sm:$0xff]  ;;  %644 = vmatprep.subr.mxu1 %v319_v33  ;;  %v186_v38 = vld [vmem:[#allocation4 + $0x2c0] sm:$0xff]  ;;  %568 = vmatpush2.msra.mxu0 %v190_v34  ;;  %v149_v34 = vld [vmem:[#allocation4 + $0x198] sm:$0xff] }
  0x73   :  { %v315_v37 = vld [vmem:[#allocation4 + $0x6c8] sm:$0xff]  ;;  %v314_v39 = vld [vmem:[#allocation4 + $0x6c0] sm:$0xff]  ;;  %645 = vmatpush2.msra.mxu1 %v318_v35  ;;  %569 = vmatprep.subr.mxu0 %v187_v36  ;;  %v148_v36 = vld [vmem:[#allocation4 + $0x190] sm:$0xff] }
  0x74   :  { %v183_v40 = vld [vmem:[#allocation4 + $0x2a8] sm:$0xff]  ;;  %646 = vmatprep.subr.mxu1 %v315_v37  ;;  %v182_v42 = vld [vmem:[#allocation4 + $0x2a0] sm:$0xff]  ;;  %570 = vmatpush2.msra.mxu0 %v186_v38  ;;  %v145_v38 = vld [vmem:[#allocation4 + $0x178] sm:$0xff] }
  0x75   :  { %v311_v41 = vld [vmem:[#allocation4 + $0x6a8] sm:$0xff]  ;;  %v310_v43 = vld [vmem:[#allocation4 + $0x6a0] sm:$0xff]  ;;  %647 = vmatpush2.msra.mxu1 %v314_v39  ;;  %571 = vmatprep.subr.mxu0 %v183_v40  ;;  %v144_v40 = vld [vmem:[#allocation4 + $0x170] sm:$0xff] }
  0x76   :  { %v179_v44 = vld [vmem:[#allocation4 + $0x288] sm:$0xff]  ;;  %648 = vmatprep.subr.mxu1 %v311_v41  ;;  %v178_v46 = vld [vmem:[#allocation4 + $0x280] sm:$0xff]  ;;  %572 = vmatpush2.msra.mxu0 %v182_v42  ;;  %v141_v42 = vld [vmem:[#allocation4 + $0x158] sm:$0xff] }
  0x77   :  { %v307_v45 = vld [vmem:[#allocation4 + $0x688] sm:$0xff]  ;;  %v306_v47 = vld [vmem:[#allocation4 + $0x680] sm:$0xff]  ;;  %649 = vmatpush2.msra.mxu1 %v310_v43  ;;  %573 = vmatprep.subr.mxu0 %v179_v44  ;;  %v140_v44 = vld [vmem:[#allocation4 + $0x150] sm:$0xff] }
  0x78   :  { %v175_v48 = vld [vmem:[#allocation4 + $0x268] sm:$0xff]  ;;  %650 = vmatprep.subr.mxu1 %v307_v45  ;;  %v174_v50 = vld [vmem:[#allocation4 + $0x260] sm:$0xff]  ;;  %574 = vmatpush2.msra.mxu0 %v178_v46  ;;  %v137_v46 = vld [vmem:[#allocation4 + $0x138] sm:$0xff] }
  0x79   :  { %v303_v49 = vld [vmem:[#allocation4 + $0x668] sm:$0xff]  ;;  %v302_v51 = vld [vmem:[#allocation4 + $0x660] sm:$0xff]  ;;  %651 = vmatpush2.msra.mxu1 %v306_v47  ;;  %575 = vmatprep.subr.mxu0 %v175_v48  ;;  %v136_v48 = vld [vmem:[#allocation4 + $0x130] sm:$0xff] }
  0x7a   :  { %v171_v52 = vld [vmem:[#allocation4 + $0x248] sm:$0xff]  ;;  %652 = vmatprep.subr.mxu1 %v303_v49  ;;  %v170_v54 = vld [vmem:[#allocation4 + $0x240] sm:$0xff]  ;;  %576 = vmatpush2.msra.mxu0 %v174_v50  ;;  %v133_v50 = vld [vmem:[#allocation4 + $0x118] sm:$0xff] }
  0x7b   :  { %v299_v53 = vld [vmem:[#allocation4 + $0x648] sm:$0xff]  ;;  %v298_v55 = vld [vmem:[#allocation4 + $0x640] sm:$0xff]  ;;  %653 = vmatpush2.msra.mxu1 %v302_v51  ;;  %577 = vmatprep.subr.mxu0 %v171_v52  ;;  %v132_v52 = vld [vmem:[#allocation4 + $0x110] sm:$0xff] }
  0x7c   :  { %v167_v56 = vld [vmem:[#allocation4 + $0x228] sm:$0xff]  ;;  %654 = vmatprep.subr.mxu1 %v299_v53  ;;  %v166_v58 = vld [vmem:[#allocation4 + $0x220] sm:$0xff]  ;;  %578 = vmatpush2.msra.mxu0 %v170_v54  ;;  %v129_v54 = vld [vmem:[#allocation4 + $0xf8] sm:$0xff] }
  0x7d   :  { %v295_v57 = vld [vmem:[#allocation4 + $0x628] sm:$0xff]  ;;  %v294_v59 = vld [vmem:[#allocation4 + $0x620] sm:$0xff]  ;;  %655 = vmatpush2.msra.mxu1 %v298_v55  ;;  %579 = vmatprep.subr.mxu0 %v167_v56  ;;  %v128_v56 = vld [vmem:[#allocation4 + $0xf0] sm:$0xff] }
  0x7e   :  { %v163_v60 = vld [vmem:[#allocation4 + $0x208] sm:$0xff]  ;;  %656 = vmatprep.subr.mxu1 %v295_v57  ;;  %v162_v62 = vld [vmem:[#allocation4 + $0x200] sm:$0xff]  ;;  %580 = vmatpush2.msra.mxu0 %v166_v58  ;;  %v125_v58 = vld [vmem:[#allocation4 + $0xd8] sm:$0xff] }
  0x7f   :  { %v291_v61 = vld [vmem:[#allocation4 + $0x608] sm:$0xff]  ;;  %657 = vmatpush2.msra.mxu1 %v294_v59  ;;  %v290_v0 = vld [vmem:[#allocation4 + $0x600] sm:$0xff]  ;;  %581 = vmatprep.subr.mxu0 %v163_v60  ;;  %v124_v60 = vld [vmem:[#allocation4 + $0xd0] sm:$0xff] }
  0x80   :  { %v87_v1 = vld [vmem:[#allocation2 + $0x18] sm:$0xff]  ;;  %658 = vmatprep.subr.mxu1 %v291_v61  ;;  %v86_v3 = vld [vmem:[#allocation2 + $0x10] sm:$0xff]  ;;  %582 = vmatpush2.msra.mxu0 %v162_v62  ;;  %v121_v62 = vld [vmem:[#allocation4 + $0xb8] sm:$0xff] }
  0x81   :  { %583 = vmatprep.mubr.f32.mxu0 %v1636_v63  ;;  %v415_v4 = vld [vmem:[#allocation4 + $0x9e8] sm:$0xff]  ;;  %659 = vmatpush2.msra.mxu1 %v290_v0  ;;  %v414_v6 = vld [vmem:[#allocation4 + $0x9e0] sm:$0xff] }
  0x82   :  { %v487_v5 = vld [vmem:[#allocation4 + $0xc28] sm:$0xff]  ;;  %660 = vmatprep.mubr.f32.mxu1 %v87_v1  ;;  %v486_v7 = vld [vmem:[#allocation4 + $0xc20] sm:$0xff]  ;;  %584 = vmatmul.mubr.f32.vlgmr.msra.gmra.mxu0 %v1638_v2  ;;  %v120_v1 = vld [vmem:[#allocation4 + $0xb0] sm:$0xff] }
  0x83   :  { %661 = vmatmul.mubr.f32.vlgmr.msra.gmra.mxu1 %v86_v3  ;;  %v411_v8 = vld [vmem:[#allocation4 + $0x9c8] sm:$0xff]  ;;  %673 = vmatprep.subr.mxu0 %v415_v4  ;;  %v94_v10 = vld [vmem:[#allocation2 + $0x50] sm:$0xff]  ;;  %v117_v4 = vld [vmem:[#allocation4 + $0x98] sm:$0xff] }
  0x84   :  { %778 = vmatprep.subr.mxu1 %v487_v5  ;;  %v410_v11 = vld [vmem:[#allocation4 + $0x9c0] sm:$0xff]  ;;  %674 = vmatpush1.msra.mxu0 %v414_v6  ;;  %v91_v12 = vld [vmem:[#allocation2 + $0x38] sm:$0xff]  ;;  %v116_v6 = vld [vmem:[#allocation4 + $0x90] sm:$0xff] }
  0x85   :  { %779 = vmatpush1.msra.mxu1 %v486_v7  ;;  %675 = vmatprep.subr.mxu0 %v411_v8  ;;  %v407_v14 = vld [vmem:[#allocation4 + $0x9a8] sm:$0xff]  ;;  %v406_v16 = vld [vmem:[#allocation4 + $0x9a0] sm:$0xff]  ;;  %v113_v8 = vld [vmem:[#allocation4 + $0x78] sm:$0xff] }
  0x86   :  { %589 = vmatprep.mubr.f32.mxu0 %v92_v9  ;;  %v483_v15 = vld [vmem:[#allocation4 + $0xc08] sm:$0xff]  ;;  %666 = vmatprep.mubr.f32.mxu1 %v94_v10  ;;  %v482_v17 = vld [vmem:[#allocation4 + $0xc00] sm:$0xff]  ;;  %v112_v10 = vld [vmem:[#allocation4 + $0x70] sm:$0xff] }
  0x87   :  { %676 = vmatpush1.msra.mxu0 %v410_v11  ;;  %667 = vmatmul.mubr.f32.gmra.mxu1 %v93_v13  ;;  %v403_v18 = vld [vmem:[#allocation4 + $0x988] sm:$0xff]  ;;  %v402_v19 = vld [vmem:[#allocation4 + $0x980] sm:$0xff] }
  0x88   :  { %590 = vmatmul.mubr.f32.gmra.mxu0 %v91_v12  ;;  %677 = vmatprep.subr.mxu0 %v407_v14  ;;  %v399_v21 = vld [vmem:[#allocation4 + $0x968] sm:$0xff]  ;;  %v90_v22 = vld [vmem:[#allocation2 + $0x30] sm:$0xff]  ;;  %v109_v12 = vld [vmem:[#allocation4 + $0x58] sm:$0xff] }
  0x89   :  { %780 = vmatprep.subr.mxu1 %v483_v15  ;;  %678 = vmatpush1.msra.mxu0 %v406_v16  ;;  %v398_v25 = vld [vmem:[#allocation4 + $0x960] sm:$0xff]  ;;  %v395_v27 = vld [vmem:[#allocation4 + $0x948] sm:$0xff]  ;;  %v108_v14 = vld [vmem:[#allocation4 + $0x50] sm:$0xff] }
  0x8a   :  { %781 = vmatpush1.msra.mxu1 %v482_v17  ;;  %679 = vmatprep.subr.mxu0 %v403_v18  ;;  %v394_v29 = vld [vmem:[#allocation4 + $0x940] sm:$0xff]  ;;  %v391_v31 = vld [vmem:[#allocation4 + $0x928] sm:$0xff]  ;;  %v105_v16 = vld [vmem:[#allocation4 + $0x38] sm:$0xff] }
  0x8b   :  { %814 = vmatprep.mubr.f32.mxu1 %v1590_v23  ;;  %680 = vmatpush1.msra.mxu0 %v402_v19  ;;  %v390_v33 = vld [vmem:[#allocation4 + $0x920] sm:$0xff]  ;;  %v387_v35 = vld [vmem:[#allocation4 + $0x908] sm:$0xff]  ;;  %v104_v18 = vld [vmem:[#allocation4 + $0x30] sm:$0xff] }
  0x8c   :  { %827 = vmatprep.subr.mxu1 %v161_v20  ;;  %681 = vmatprep.subr.mxu0 %v399_v21  ;;  %v386_v37 = vld [vmem:[#allocation4 + $0x900] sm:$0xff]  ;;  %v383_v39 = vld [vmem:[#allocation4 + $0x8e8] sm:$0xff]  ;;  %v101_v20 = vld [vmem:[#allocation4 + $0x18] sm:$0xff] }
  0x8d   :  { %1373 = vmatmul.mubr.msk.f32.vlgmr.msra.gmra.mxu1 %vm512_vm0, %v90_v22  ;;  %682 = vmatpush1.msra.mxu0 %v398_v25  ;;  %v382_v41 = vld [vmem:[#allocation4 + $0x8e0] sm:$0xff]  ;;  %v379_v43 = vld [vmem:[#allocation4 + $0x8c8] sm:$0xff]  ;;  %v100_v22 = vld [vmem:[#allocation4 + $0x10] sm:$0xff] }
  0x8e   :  { %828 = vmatpush1.msra.mxu1 %v160_v24  ;;  %683 = vmatprep.subr.mxu0 %v395_v27  ;;  %v378_v45 = vld [vmem:[#allocation4 + $0x8c0] sm:$0xff]  ;;  %v375_v47 = vld [vmem:[#allocation4 + $0x8a8] sm:$0xff]  ;;  %v225_v25 = vld [vmem:[#allocation4 + $0x3f8] sm:$0xff] }
  0x8f   :  { %829 = vmatprep.subr.mxu1 %v157_v26  ;;  %684 = vmatpush1.msra.mxu0 %v394_v29  ;;  %v374_v49 = vld [vmem:[#allocation4 + $0x8a0] sm:$0xff]  ;;  %v371_v51 = vld [vmem:[#allocation4 + $0x888] sm:$0xff]  ;;  %v224_v27 = vld [vmem:[#allocation4 + $0x3f0] sm:$0xff] }
  0x90   :  { %830 = vmatpush1.msra.mxu1 %v156_v28  ;;  %685 = vmatprep.subr.mxu0 %v391_v31  ;;  %v370_v53 = vld [vmem:[#allocation4 + $0x880] sm:$0xff]  ;;  %v367_v55 = vld [vmem:[#allocation4 + $0x868] sm:$0xff]  ;;  %v221_v29 = vld [vmem:[#allocation4 + $0x3d8] sm:$0xff] }
  0x91   :  { %831 = vmatprep.subr.mxu1 %v153_v30  ;;  %686 = vmatpush1.msra.mxu0 %v390_v33  ;;  %v366_v57 = vld [vmem:[#allocation4 + $0x860] sm:$0xff]  ;;  %v363_v59 = vld [vmem:[#allocation4 + $0x848] sm:$0xff]  ;;  %v220_v31 = vld [vmem:[#allocation4 + $0x3d0] sm:$0xff] }
  0x92   :  { %832 = vmatpush1.msra.mxu1 %v152_v32  ;;  %687 = vmatprep.subr.mxu0 %v387_v35  ;;  %v362_v61 = vld [vmem:[#allocation4 + $0x840] sm:$0xff]  ;;  %v359_v0 = vld [vmem:[#allocation4 + $0x828] sm:$0xff]  ;;  %v217_v33 = vld [vmem:[#allocation4 + $0x3b8] sm:$0xff] }
  0x93   :  { %833 = vmatprep.subr.mxu1 %v149_v34  ;;  %688 = vmatpush1.msra.mxu0 %v386_v37  ;;  %v358_v3 = vld [vmem:[#allocation4 + $0x820] sm:$0xff]  ;;  %v355_v5 = vld [vmem:[#allocation4 + $0x808] sm:$0xff]  ;;  %v216_v35 = vld [vmem:[#allocation4 + $0x3b0] sm:$0xff] }
  0x94   :  { %834 = vmatpush1.msra.mxu1 %v148_v36  ;;  %689 = vmatprep.subr.mxu0 %v383_v39  ;;  %v354_v7 = vld [vmem:[#allocation4 + $0x800] sm:$0xff]  ;;  %v479_v9 = vld [vmem:[#allocation4 + $0xbe8] sm:$0xff]  ;;  %v213_v37 = vld [vmem:[#allocation4 + $0x398] sm:$0xff] }
  0x95   :  { %835 = vmatprep.subr.mxu1 %v145_v38  ;;  %690 = vmatpush1.msra.mxu0 %v382_v41  ;;  %v478_v11 = vld [vmem:[#allocation4 + $0xbe0] sm:$0xff]  ;;  %v475_v13 = vld [vmem:[#allocation4 + $0xbc8] sm:$0xff]  ;;  %v212_v39 = vld [vmem:[#allocation4 + $0x390] sm:$0xff] }
  0x96   :  { %836 = vmatpush1.msra.mxu1 %v144_v40  ;;  %691 = vmatprep.subr.mxu0 %v379_v43  ;;  %v474_v15 = vld [vmem:[#allocation4 + $0xbc0] sm:$0xff]  ;;  %v471_v17 = vld [vmem:[#allocation4 + $0xba8] sm:$0xff]  ;;  %v209_v41 = vld [vmem:[#allocation4 + $0x378] sm:$0xff] }
  0x97   :  { %837 = vmatprep.subr.mxu1 %v141_v42  ;;  %692 = vmatpush1.msra.mxu0 %v378_v45  ;;  %v470_v19 = vld [vmem:[#allocation4 + $0xba0] sm:$0xff]  ;;  %v467_v21 = vld [vmem:[#allocation4 + $0xb88] sm:$0xff]  ;;  %v208_v43 = vld [vmem:[#allocation4 + $0x370] sm:$0xff] }
  0x98   :  { %838 = vmatpush1.msra.mxu1 %v140_v44  ;;  %693 = vmatprep.subr.mxu0 %v375_v47  ;;  %v466_v24 = vld [vmem:[#allocation4 + $0xb80] sm:$0xff]  ;;  %v463_v26 = vld [vmem:[#allocation4 + $0xb68] sm:$0xff]  ;;  %v205_v45 = vld [vmem:[#allocation4 + $0x358] sm:$0xff] }
  0x99   :  { %839 = vmatprep.subr.mxu1 %v137_v46  ;;  %694 = vmatpush1.msra.mxu0 %v374_v49  ;;  %v462_v28 = vld [vmem:[#allocation4 + $0xb60] sm:$0xff]  ;;  %v459_v30 = vld [vmem:[#allocation4 + $0xb48] sm:$0xff]  ;;  %v204_v47 = vld [vmem:[#allocation4 + $0x350] sm:$0xff] }
  0x9a   :  { %840 = vmatpush1.msra.mxu1 %v136_v48  ;;  %695 = vmatprep.subr.mxu0 %v371_v51  ;;  %v458_v32 = vld [vmem:[#allocation4 + $0xb40] sm:$0xff]  ;;  %v455_v34 = vld [vmem:[#allocation4 + $0xb28] sm:$0xff]  ;;  %v201_v49 = vld [vmem:[#allocation4 + $0x338] sm:$0xff] }
  0x9b   :  { %841 = vmatprep.subr.mxu1 %v133_v50  ;;  %696 = vmatpush1.msra.mxu0 %v370_v53  ;;  %v454_v36 = vld [vmem:[#allocation4 + $0xb20] sm:$0xff]  ;;  %v451_v38 = vld [vmem:[#allocation4 + $0xb08] sm:$0xff]  ;;  %v200_v51 = vld [vmem:[#allocation4 + $0x330] sm:$0xff] }
  0x9c   :  { %842 = vmatpush1.msra.mxu1 %v132_v52  ;;  %697 = vmatprep.subr.mxu0 %v367_v55  ;;  %v450_v40 = vld [vmem:[#allocation4 + $0xb00] sm:$0xff]  ;;  %v447_v42 = vld [vmem:[#allocation4 + $0xae8] sm:$0xff]  ;;  %v197_v53 = vld [vmem:[#allocation4 + $0x318] sm:$0xff] }
  0x9d   :  { %843 = vmatprep.subr.mxu1 %v129_v54  ;;  %698 = vmatpush1.msra.mxu0 %v366_v57  ;;  %v446_v44 = vld [vmem:[#allocation4 + $0xae0] sm:$0xff]  ;;  %v443_v46 = vld [vmem:[#allocation4 + $0xac8] sm:$0xff]  ;;  %v196_v55 = vld [vmem:[#allocation4 + $0x310] sm:$0xff] }
  0x9e   :  { %844 = vmatpush1.msra.mxu1 %v128_v56  ;;  %699 = vmatprep.subr.mxu0 %v363_v59  ;;  %v442_v48 = vld [vmem:[#allocation4 + $0xac0] sm:$0xff]  ;;  %v439_v50 = vld [vmem:[#allocation4 + $0xaa8] sm:$0xff]  ;;  %v193_v57 = vld [vmem:[#allocation4 + $0x2f8] sm:$0xff] }
  0x9f   :  { %845 = vmatprep.subr.mxu1 %v125_v58  ;;  %700 = vmatpush1.msra.mxu0 %v362_v61  ;;  %v438_v52 = vld [vmem:[#allocation4 + $0xaa0] sm:$0xff]  ;;  %v435_v54 = vld [vmem:[#allocation4 + $0xa88] sm:$0xff]  ;;  %v192_v59 = vld [vmem:[#allocation4 + $0x2f0] sm:$0xff] }
  0xa0   :  { %846 = vmatpush1.msra.mxu1 %v124_v60  ;;  %701 = vmatprep.subr.mxu0 %v359_v0  ;;  %v434_v56 = vld [vmem:[#allocation4 + $0xa80] sm:$0xff]  ;;  %v431_v58 = vld [vmem:[#allocation4 + $0xa68] sm:$0xff]  ;;  %v189_v61 = vld [vmem:[#allocation4 + $0x2d8] sm:$0xff] }
  0xa1   :  { %847 = vmatprep.subr.mxu1 %v121_v62  ;;  %702 = vmatpush1.msra.mxu0 %v358_v3  ;;  %v430_v60 = vld [vmem:[#allocation4 + $0xa60] sm:$0xff]  ;;  %v427_v62 = vld [vmem:[#allocation4 + $0xa48] sm:$0xff]  ;;  %v188_v0 = vld [vmem:[#allocation4 + $0x2d0] sm:$0xff] }
  0xa2   :  { %848 = vmatpush1.msra.mxu1 %v120_v1  ;;  %703 = vmatprep.subr.mxu0 %v355_v5  ;;  %v426_v1 = vld [vmem:[#allocation4 + $0xa40] sm:$0xff]  ;;  %v185_v3 = vld [vmem:[#allocation4 + $0x2b8] sm:$0xff]  ;;  %v184_v5 = vld [vmem:[#allocation4 + $0x2b0] sm:$0xff] }
  0xa3   :  { %849 = vmatprep.subr.mxu1 %v117_v4  ;;  %704 = vmatpush1.msra.mxu0 %v354_v7  ;;  %v423_v4 = vld [vmem:[#allocation4 + $0xa28] sm:$0xff]  ;;  %v181_v7 = vld [vmem:[#allocation4 + $0x298] sm:$0xff] }
  0xa4   :  { %850 = vmatpush1.msra.mxu1 %v116_v6  ;;  %705 = vmatprep.subr.mxu0 %v479_v9  ;;  %v422_v6 = vld [vmem:[#allocation4 + $0xa20] sm:$0xff]  ;;  %v180_v9 = vld [vmem:[#allocation4 + $0x290] sm:$0xff] }
  0xa5   :  { %851 = vmatprep.subr.mxu1 %v113_v8  ;;  %706 = vmatpush2.msra.mxu0 %v478_v11  ;;  %v419_v8 = vld [vmem:[#allocation4 + $0xa08] sm:$0xff]  ;;  %v1644_v11 = vld [vmem:[#allocation2 + $0x28] sm:$0xff] }
  0xa6   :  { %852 = vmatpush1.msra.mxu1 %v112_v10  ;;  %707 = vmatprep.subr.mxu0 %v475_v13  ;;  %v418_v10 = vld [vmem:[#allocation4 + $0xa00] sm:$0xff]  ;;  %v1646_v13 = vld [vmem:[#allocation2 + $0x20] sm:$0xff] }
  0xa7   :  { %853 = vmatprep.subr.mxu1 %v109_v12  ;;  %708 = vmatpush2.msra.mxu0 %v474_v15  ;;  %v177_v12 = vld [vmem:[#allocation4 + $0x278] sm:$0xff] }
  0xa8   :  { %854 = vmatpush1.msra.mxu1 %v108_v14  ;;  %709 = vmatprep.subr.mxu0 %v471_v17  ;;  %v176_v14 = vld [vmem:[#allocation4 + $0x270] sm:$0xff]  ;;  %v289_v15 = vld [vmem:[#allocation4 + $0x5f8] sm:$0xff] }
  0xa9   :  { %855 = vmatprep.subr.mxu1 %v105_v16  ;;  %710 = vmatpush2.msra.mxu0 %v470_v19  ;;  %v173_v16 = vld [vmem:[#allocation4 + $0x258] sm:$0xff]  ;;  %v288_v17 = vld [vmem:[#allocation4 + $0x5f0] sm:$0xff] }
  0xaa   :  { %856 = vmatpush1.msra.mxu1 %v104_v18  ;;  %711 = vmatprep.subr.mxu0 %v467_v21  ;;  %v172_v18 = vld [vmem:[#allocation4 + $0x250] sm:$0xff]  ;;  %v285_v19 = vld [vmem:[#allocation4 + $0x5d8] sm:$0xff] }
  0xab   :  { %857 = vmatprep.subr.mxu1 %v101_v20  ;;  %712 = vmatpush2.msra.mxu0 %v466_v24  ;;  %v1650_v20 = vld [vmem:[#allocation2 + $0x60] sm:$0xff]  ;;  %v1652_v21 = vld [vmem:[#allocation2 + $0x68] sm:$0xff] }
  0xac   :  { %858 = vmatpush1.msra.mxu1 %v100_v22  ;;  %713 = vmatprep.subr.mxu0 %v463_v26  ;;  %v169_v22 = vld [vmem:[#allocation4 + $0x238] sm:$0xff]  ;;  %v284_v24 = vld [vmem:[#allocation4 + $0x5d0] sm:$0xff] }
  0xad   :  { %859 = vmatprep.subr.mxu1 %v225_v25  ;;  %714 = vmatpush2.msra.mxu0 %v462_v28  ;;  %v1655_v25 = vld [vmem:[#allocation2 + $0x58] sm:$0xff]  ;;  %v168_v26 = vld [vmem:[#allocation4 + $0x230] sm:$0xff]  ;;  %v165_v28 = vld [vmem:[#allocation4 + $0x218] sm:$0xff] }
  0xae   :  { %860 = vmatpush2.msra.mxu1 %v224_v27  ;;  %715 = vmatprep.subr.mxu0 %v459_v30  ;;  %v281_v27 = vld [vmem:[#allocation4 + $0x5b8] sm:$0xff]  ;;  %v164_v30 = vld [vmem:[#allocation4 + $0x210] sm:$0xff] }
  0xaf   :  { %861 = vmatprep.subr.mxu1 %v221_v29  ;;  %716 = vmatpush2.msra.mxu0 %v458_v32  ;;  %v280_v29 = vld [vmem:[#allocation4 + $0x5b0] sm:$0xff] }
  0xb0   :  { %862 = vmatpush2.msra.mxu1 %v220_v31  ;;  %717 = vmatprep.subr.mxu0 %v455_v34  ;;  %v277_v31 = vld [vmem:[#allocation4 + $0x598] sm:$0xff]  ;;  %v276_v32 = vld [vmem:[#allocation4 + $0x590] sm:$0xff] }
  0xb1   :  { %863 = vmatprep.subr.mxu1 %v217_v33  ;;  %718 = vmatpush2.msra.mxu0 %v454_v36  ;;  %v417_v33 = vld [vmem:[#allocation4 + $0x9f8] sm:$0xff]  ;;  %v272_v36 = vld [vmem:[#allocation4 + $0x570] sm:$0xff] }
  0xb2   :  { %864 = vmatpush2.msra.mxu1 %v216_v35  ;;  %719 = vmatprep.subr.mxu0 %v451_v38  ;;  %v273_v34 = vld [vmem:[#allocation4 + $0x578] sm:$0xff]  ;;  %v416_v35 = vld [vmem:[#allocation4 + $0x9f0] sm:$0xff] }
  0xb3   :  { %865 = vmatprep.subr.mxu1 %v213_v37  ;;  %720 = vmatpush2.msra.mxu0 %v450_v40  ;;  %v413_v37 = vld [vmem:[#allocation4 + $0x9d8] sm:$0xff]  ;;  %v268_v40 = vld [vmem:[#allocation4 + $0x550] sm:$0xff] }
  0xb4   :  { %866 = vmatpush2.msra.mxu1 %v212_v39  ;;  %721 = vmatprep.subr.mxu0 %v447_v42  ;;  %v269_v38 = vld [vmem:[#allocation4 + $0x558] sm:$0xff]  ;;  %v412_v39 = vld [vmem:[#allocation4 + $0x9d0] sm:$0xff] }
  0xb5   :  { %867 = vmatprep.subr.mxu1 %v209_v41  ;;  %722 = vmatpush2.msra.mxu0 %v446_v44  ;;  %v409_v41 = vld [vmem:[#allocation4 + $0x9b8] sm:$0xff] }
  0xb6   :  { %868 = vmatpush2.msra.mxu1 %v208_v43  ;;  %723 = vmatprep.subr.mxu0 %v443_v46  ;;  %v265_v42 = vld [vmem:[#allocation4 + $0x538] sm:$0xff]  ;;  %v408_v43 = vld [vmem:[#allocation4 + $0x9b0] sm:$0xff] }
  0xb7   :  { %869 = vmatprep.subr.mxu1 %v205_v45  ;;  %724 = vmatpush2.msra.mxu0 %v442_v48  ;;  %v405_v44 = vld [vmem:[#allocation4 + $0x998] sm:$0xff]  ;;  %v260_v46 = vld [vmem:[#allocation4 + $0x510] sm:$0xff] }
  0xb8   :  { %870 = vmatpush2.msra.mxu1 %v204_v47  ;;  %725 = vmatprep.subr.mxu0 %v439_v50  ;;  %v261_v45 = vld [vmem:[#allocation4 + $0x518] sm:$0xff]  ;;  %v256_v50 = vld [vmem:[#allocation4 + $0x4f0] sm:$0xff] }
  0xb9   :  { %871 = vmatprep.subr.mxu1 %v201_v49  ;;  %726 = vmatpush2.msra.mxu0 %v438_v52  ;;  %v401_v47 = vld [vmem:[#allocation4 + $0x978] sm:$0xff]  ;;  %v400_v49 = vld [vmem:[#allocation4 + $0x970] sm:$0xff] }
  0xba   :  { %872 = vmatpush2.msra.mxu1 %v200_v51  ;;  %727 = vmatprep.subr.mxu0 %v435_v54  ;;  %v257_v48 = vld [vmem:[#allocation4 + $0x4f8] sm:$0xff]  ;;  %v252_v54 = vld [vmem:[#allocation4 + $0x4d0] sm:$0xff] }
  0xbb   :  { %873 = vmatprep.subr.mxu1 %v197_v53  ;;  %728 = vmatpush2.msra.mxu0 %v434_v56  ;;  %v397_v51 = vld [vmem:[#allocation4 + $0x958] sm:$0xff]  ;;  %v396_v53 = vld [vmem:[#allocation4 + $0x950] sm:$0xff] }
  0xbc   :  { %874 = vmatpush2.msra.mxu1 %v196_v55  ;;  %729 = vmatprep.subr.mxu0 %v431_v58  ;;  %v253_v52 = vld [vmem:[#allocation4 + $0x4d8] sm:$0xff]  ;;  %v248_v58 = vld [vmem:[#allocation4 + $0x4b0] sm:$0xff] }
  0xbd   :  { %875 = vmatprep.subr.mxu1 %v193_v57  ;;  %730 = vmatpush2.msra.mxu0 %v430_v60  ;;  %v393_v55 = vld [vmem:[#allocation4 + $0x938] sm:$0xff]  ;;  %v392_v57 = vld [vmem:[#allocation4 + $0x930] sm:$0xff] }
  0xbe   :  { %876 = vmatpush2.msra.mxu1 %v192_v59  ;;  %731 = vmatprep.subr.mxu0 %v427_v62  ;;  %v249_v56 = vld [vmem:[#allocation4 + $0x4b8] sm:$0xff]  ;;  %v244_v62 = vld [vmem:[#allocation4 + $0x490] sm:$0xff] }
  0xbf   :  { %877 = vmatprep.subr.mxu1 %v189_v61  ;;  %732 = vmatpush2.msra.mxu0 %v426_v1  ;;  %v389_v59 = vld [vmem:[#allocation4 + $0x918] sm:$0xff]  ;;  %v388_v61 = vld [vmem:[#allocation4 + $0x910] sm:$0xff] }
  0xc0   :  { %878 = vmatpush2.msra.mxu1 %v188_v0  ;;  %733 = vmatprep.subr.mxu0 %v423_v4  ;;  %v245_v60 = vld [vmem:[#allocation4 + $0x498] sm:$0xff]  ;;  %v240_v4 = vld [vmem:[#allocation4 + $0x470] sm:$0xff] }
  0xc1   :  { %879 = vmatprep.subr.mxu1 %v185_v3  ;;  %734 = vmatpush2.msra.mxu0 %v422_v6  ;;  %v385_v0 = vld [vmem:[#allocation4 + $0x8f8] sm:$0xff]  ;;  %v384_v3 = vld [vmem:[#allocation4 + $0x8f0] sm:$0xff] }
  0xc2   :  { %880 = vmatpush2.msra.mxu1 %v184_v5  ;;  %735 = vmatprep.subr.mxu0 %v419_v8  ;;  %v241_v1 = vld [vmem:[#allocation4 + $0x478] sm:$0xff]  ;;  %v236_v8 = vld [vmem:[#allocation4 + $0x450] sm:$0xff] }
  0xc3   :  { %881 = vmatprep.subr.mxu1 %v181_v7  ;;  %736 = vmatpush2.msra.mxu0 %v418_v10  ;;  %v381_v5 = vld [vmem:[#allocation4 + $0x8d8] sm:$0xff]  ;;  %v380_v7 = vld [vmem:[#allocation4 + $0x8d0] sm:$0xff] }
  0xc4   :  { %882 = vmatpush2.msra.mxu1 %v180_v9  ;;  %737 = vmatprep.mubr.f32.mxu0 %v1644_v11  ;;  %v237_v6 = vld [vmem:[#allocation4 + $0x458] sm:$0xff] }
  0xc5   :  { %883 = vmatprep.subr.mxu1 %v177_v12  ;;  %738 = vmatmul.mubr.f32.vlgmr.msra.gmra.mxu0 %v1646_v13  ;;  %v377_v9 = vld [vmem:[#allocation4 + $0x8b8] sm:$0xff]  ;;  %v376_v12 = vld [vmem:[#allocation4 + $0x8b0] sm:$0xff] }
  0xc6   :  { %884 = vmatpush2.msra.mxu1 %v176_v14  ;;  %904 = vmatprep.subr.mxu0 %v289_v15  ;;  %v233_v10 = vld [vmem:[#allocation4 + $0x438] sm:$0xff]  ;;  %v232_v14 = vld [vmem:[#allocation4 + $0x430] sm:$0xff] }
  0xc7   :  { %885 = vmatprep.subr.mxu1 %v173_v16  ;;  %905 = vmatpush1.msra.mxu0 %v288_v17  ;;  %v373_v15 = vld [vmem:[#allocation4 + $0x898] sm:$0xff]  ;;  %v372_v17 = vld [vmem:[#allocation4 + $0x890] sm:$0xff] }
  0xc8   :  { %820 = vmatprep.mubr.f32.mxu1 %v1590_v23  ;;  %886 = vmatpush2.msra.mxu1 %v172_v18  ;;  %v229_v16 = vld [vmem:[#allocation4 + $0x418] sm:$0xff]  ;;  %v228_v18 = vld [vmem:[#allocation4 + $0x410] sm:$0xff] }
  0xc9   :  { %906 = vmatprep.subr.mxu0 %v285_v19  ;;  %743 = vmatprep.mubr.f32.mxu0 %v1650_v20  ;;  %v369_v19 = vld [vmem:[#allocation4 + $0x878] sm:$0xff] }
  0xca   :  { %1374 = vmatmul.mubr.msk.f32.gmra.mxu1 %vm512_vm0, %v1652_v21  ;;  %887 = vmatprep.subr.mxu1 %v169_v22  ;;  %v353_v22 = vld [vmem:[#allocation4 + $0x7f8] sm:$0xff] }
  0xcb   :  { %907 = vmatpush1.msra.mxu0 %v284_v24  ;;  %888 = vmatpush2.msra.mxu1 %v168_v26  ;;  %v368_v24 = vld [vmem:[#allocation4 + $0x870] sm:$0xff] }
  0xcc   :  { %744 = vmatmul.mubr.f32.gmra.mxu0 %v1655_v25  ;;  %908 = vmatprep.subr.mxu0 %v281_v27  ;;  %v352_v26 = vld [vmem:[#allocation4 + $0x7f0] sm:$0xff]  ;;  %v365_v27 = vld [vmem:[#allocation4 + $0x858] sm:$0xff] }
  0xcd   :  { %889 = vmatprep.subr.mxu1 %v165_v28  ;;  %909 = vmatpush1.msra.mxu0 %v280_v29  ;;  %v349_v28 = vld [vmem:[#allocation4 + $0x7d8] sm:$0xff]  ;;  %v364_v29 = vld [vmem:[#allocation4 + $0x850] sm:$0xff] }
  0xce   :  { %890 = vmatpush2.msra.mxu1 %v164_v30  ;;  %891 = vmatprep.mubr.f32.mxu1 %v1636_v63  ;;  %v264_v63 = vld [vmem:[#allocation4 + $0x530] sm:$0xff] }
  0xcf   :  { %910 = vmatprep.subr.mxu0 %v277_v31  ;;  %892 = vmatmul.mubr.f32.vlgmr.msra.gmra.mxu1 %v1638_v2  ;;  %v404_v2 = vld [vmem:[#allocation4 + $0x990] sm:$0xff]  ;;  %v361_v31 = vld [vmem:[#allocation4 + $0x838] sm:$0xff] }
  0xd0   :  { %911 = vmatpush1.msra.mxu0 %v276_v32  ;;  %981 = vmatprep.subr.mxu1 %v417_v33  ;;  %v348_v30 = vld [vmem:[#allocation4 + $0x7d0] sm:$0xff]  ;;  %v345_v32 = vld [vmem:[#allocation4 + $0x7b8] sm:$0xff] }
  0xd1   :  { %912 = vmatprep.subr.mxu0 %v273_v34  ;;  %982 = vmatpush1.msra.mxu1 %v416_v35  ;;  %v360_v33 = vld [vmem:[#allocation4 + $0x830] sm:$0xff]  ;;  %v357_v35 = vld [vmem:[#allocation4 + $0x818] sm:$0xff] }
  0xd2   :  { %913 = vmatpush1.msra.mxu0 %v272_v36  ;;  %983 = vmatprep.subr.mxu1 %v413_v37  ;;  %v344_v34 = vld [vmem:[#allocation4 + $0x7b0] sm:$0xff]  ;;  %v341_v36 = vld [vmem:[#allocation4 + $0x798] sm:$0xff] }
  0xd3   :  { %914 = vmatprep.subr.mxu0 %v269_v38  ;;  %984 = vmatpush1.msra.mxu1 %v412_v39  ;;  %v356_v37 = vld [vmem:[#allocation4 + $0x810] sm:$0xff]  ;;  %v481_v39 = vld [vmem:[#allocation4 + $0xbf8] sm:$0xff] }
  0xd4   :  { %915 = vmatpush1.msra.mxu0 %v268_v40  ;;  %985 = vmatprep.subr.mxu1 %v409_v41  ;;  %v340_v38 = vld [vmem:[#allocation4 + $0x790] sm:$0xff]  ;;  %v337_v40 = vld [vmem:[#allocation4 + $0x778] sm:$0xff] }
  0xd5   :  { %916 = vmatprep.subr.mxu0 %v265_v42  ;;  %986 = vmatpush1.msra.mxu1 %v408_v43  ;;  %v480_v41 = vld [vmem:[#allocation4 + $0xbf0] sm:$0xff]  ;;  %v477_v43 = vld [vmem:[#allocation4 + $0xbd8] sm:$0xff] }
  0xd6   :  { %917 = vmatpush1.msra.mxu0 %v264_v63  ;;  %987 = vmatprep.subr.mxu1 %v405_v44  ;;  %v336_v42 = vld [vmem:[#allocation4 + $0x770] sm:$0xff]  ;;  %v333_v63 = vld [vmem:[#allocation4 + $0x758] sm:$0xff] }
  0xd7   :  { %918 = vmatprep.subr.mxu0 %v261_v45  ;;  %988 = vmatpush1.msra.mxu1 %v404_v2  ;;  %v476_v44 = vld [vmem:[#allocation4 + $0xbd0] sm:$0xff]  ;;  %v473_v2 = vld [vmem:[#allocation4 + $0xbb8] sm:$0xff] }
  0xd8   :  { %919 = vmatpush1.msra.mxu0 %v260_v46  ;;  %989 = vmatprep.subr.mxu1 %v401_v47  ;;  %v332_v45 = vld [vmem:[#allocation4 + $0x750] sm:$0xff]  ;;  %v329_v46 = vld [vmem:[#allocation4 + $0x738] sm:$0xff] }
  0xd9   :  { %920 = vmatprep.subr.mxu0 %v257_v48  ;;  %990 = vmatpush1.msra.mxu1 %v400_v49  ;;  %v472_v47 = vld [vmem:[#allocation4 + $0xbb0] sm:$0xff]  ;;  %v469_v49 = vld [vmem:[#allocation4 + $0xb98] sm:$0xff] }
  0xda   :  { %921 = vmatpush1.msra.mxu0 %v256_v50  ;;  %991 = vmatprep.subr.mxu1 %v397_v51  ;;  %v328_v48 = vld [vmem:[#allocation4 + $0x730] sm:$0xff]  ;;  %v325_v50 = vld [vmem:[#allocation4 + $0x718] sm:$0xff] }
  0xdb   :  { %922 = vmatprep.subr.mxu0 %v253_v52  ;;  %992 = vmatpush1.msra.mxu1 %v396_v53  ;;  %v468_v51 = vld [vmem:[#allocation4 + $0xb90] sm:$0xff]  ;;  %v465_v53 = vld [vmem:[#allocation4 + $0xb78] sm:$0xff] }
  0xdc   :  { %923 = vmatpush1.msra.mxu0 %v252_v54  ;;  %993 = vmatprep.subr.mxu1 %v393_v55  ;;  %v324_v52 = vld [vmem:[#allocation4 + $0x710] sm:$0xff]  ;;  %v321_v54 = vld [vmem:[#allocation4 + $0x6f8] sm:$0xff] }
  0xdd   :  { %924 = vmatprep.subr.mxu0 %v249_v56  ;;  %994 = vmatpush1.msra.mxu1 %v392_v57  ;;  %v464_v55 = vld [vmem:[#allocation4 + $0xb70] sm:$0xff]  ;;  %v461_v57 = vld [vmem:[#allocation4 + $0xb58] sm:$0xff] }
  0xde   :  { %925 = vmatpush1.msra.mxu0 %v248_v58  ;;  %995 = vmatprep.subr.mxu1 %v389_v59  ;;  %v320_v56 = vld [vmem:[#allocation4 + $0x6f0] sm:$0xff]  ;;  %v317_v58 = vld [vmem:[#allocation4 + $0x6d8] sm:$0xff] }
  0xdf   :  { %926 = vmatprep.subr.mxu0 %v245_v60  ;;  %996 = vmatpush1.msra.mxu1 %v388_v61  ;;  %v460_v59 = vld [vmem:[#allocation4 + $0xb50] sm:$0xff]  ;;  %v457_v61 = vld [vmem:[#allocation4 + $0xb38] sm:$0xff] }
  0xe0   :  { %927 = vmatpush1.msra.mxu0 %v244_v62  ;;  %997 = vmatprep.subr.mxu1 %v385_v0  ;;  %v316_v60 = vld [vmem:[#allocation4 + $0x6d0] sm:$0xff]  ;;  %v313_v62 = vld [vmem:[#allocation4 + $0x6b8] sm:$0xff] }
  0xe1   :  { %928 = vmatprep.subr.mxu0 %v241_v1  ;;  %998 = vmatpush1.msra.mxu1 %v384_v3  ;;  %v456_v0 = vld [vmem:[#allocation4 + $0xb30] sm:$0xff]  ;;  %v453_v3 = vld [vmem:[#allocation4 + $0xb18] sm:$0xff] }
  0xe2   :  { %929 = vmatpush1.msra.mxu0 %v240_v4  ;;  %999 = vmatprep.subr.mxu1 %v381_v5  ;;  %v312_v1 = vld [vmem:[#allocation4 + $0x6b0] sm:$0xff]  ;;  %v309_v4 = vld [vmem:[#allocation4 + $0x698] sm:$0xff] }
  0xe3   :  { %930 = vmatprep.subr.mxu0 %v237_v6  ;;  %1000 = vmatpush1.msra.mxu1 %v380_v7  ;;  %v452_v5 = vld [vmem:[#allocation4 + $0xb10] sm:$0xff]  ;;  %v449_v7 = vld [vmem:[#allocation4 + $0xaf8] sm:$0xff] }
  0xe4   :  { %931 = vmatpush1.msra.mxu0 %v236_v8  ;;  %1001 = vmatprep.subr.mxu1 %v377_v9  ;;  %v308_v6 = vld [vmem:[#allocation4 + $0x690] sm:$0xff]  ;;  %v305_v8 = vld [vmem:[#allocation4 + $0x678] sm:$0xff] }
  0xe5   :  { %932 = vmatprep.subr.mxu0 %v233_v10  ;;  %1002 = vmatpush1.msra.mxu1 %v376_v12  ;;  %v448_v9 = vld [vmem:[#allocation4 + $0xaf0] sm:$0xff]  ;;  %v445_v12 = vld [vmem:[#allocation4 + $0xad8] sm:$0xff] }
  0xe6   :  { %933 = vmatpush1.msra.mxu0 %v232_v14  ;;  %1003 = vmatprep.subr.mxu1 %v373_v15  ;;  %v304_v10 = vld [vmem:[#allocation4 + $0x670] sm:$0xff]  ;;  %v301_v14 = vld [vmem:[#allocation4 + $0x658] sm:$0xff] }
  0xe7   :  { %934 = vmatprep.subr.mxu0 %v229_v16  ;;  %1004 = vmatpush1.msra.mxu1 %v372_v17  ;;  %v444_v15 = vld [vmem:[#allocation4 + $0xad0] sm:$0xff]  ;;  %v441_v17 = vld [vmem:[#allocation4 + $0xab8] sm:$0xff] }
  0xe8   :  { %935 = vmatpush1.msra.mxu0 %v228_v18  ;;  %1005 = vmatprep.subr.mxu1 %v369_v19  ;;  %v300_v16 = vld [vmem:[#allocation4 + $0x650] sm:$0xff]  ;;  %v297_v18 = vld [vmem:[#allocation4 + $0x638] sm:$0xff] }
  0xe9   :  { %936 = vmatprep.subr.mxu0 %v353_v22  ;;  %1006 = vmatpush1.msra.mxu1 %v368_v24  ;;  %v440_v19 = vld [vmem:[#allocation4 + $0xab0] sm:$0xff]  ;;  %v437_v24 = vld [vmem:[#allocation4 + $0xa98] sm:$0xff] }
  0xea   :  { %937 = vmatpush2.msra.mxu0 %v352_v26  ;;  %1007 = vmatprep.subr.mxu1 %v365_v27  ;;  %v296_v22 = vld [vmem:[#allocation4 + $0x630] sm:$0xff]  ;;  %v293_v26 = vld [vmem:[#allocation4 + $0x618] sm:$0xff] }
  0xeb   :  { %938 = vmatprep.subr.mxu0 %v349_v28  ;;  %1008 = vmatpush1.msra.mxu1 %v364_v29  ;;  %v436_v27 = vld [vmem:[#allocation4 + $0xa90] sm:$0xff]  ;;  %v433_v29 = vld [vmem:[#allocation4 + $0xa78] sm:$0xff] }
  0xec   :  { %939 = vmatpush2.msra.mxu0 %v348_v30  ;;  %1009 = vmatprep.subr.mxu1 %v361_v31  ;;  %v292_v28 = vld [vmem:[#allocation4 + $0x610] sm:$0xff]  ;;  %v429_v31 = vld [vmem:[#allocation4 + $0xa58] sm:$0xff] }
  0xed   :  { %940 = vmatprep.subr.mxu0 %v345_v32  ;;  %1010 = vmatpush1.msra.mxu1 %v360_v33  ;;  %v432_v30 = vld [vmem:[#allocation4 + $0xa70] sm:$0xff]  ;;  %v1466_v32 = vld [vmem:[#allocation2 + $0x18] sm:$0xff]  ;;  %v489_v33 = vld [vmem:[#allocation4 + $0xc38] sm:$0xff] }
  0xee   :  { %941 = vmatpush2.msra.mxu0 %v344_v34  ;;  %1011 = vmatprep.subr.mxu1 %v357_v35  ;;  %v1467_v34 = vld [vmem:[#allocation2 + $0x10] sm:$0xff]  ;;  %v428_v35 = vld [vmem:[#allocation4 + $0xa50] sm:$0xff] }
  0xef   :  { %942 = vmatprep.subr.mxu0 %v341_v36  ;;  %1012 = vmatpush1.msra.mxu1 %v356_v37  ;;  %v488_v36 = vld [vmem:[#allocation4 + $0xc30] sm:$0xff] }
  0xf0   :  { %943 = vmatpush2.msra.mxu0 %v340_v38  ;;  %1013 = vmatprep.subr.mxu1 %v481_v39  ;;  %v1468_v37 = vld [vmem:[#allocation2 + $0x40] sm:$0xff]  ;;  %v425_v38 = vld [vmem:[#allocation4 + $0xa38] sm:$0xff]  ;;  %v1469_v39 = vld [vmem:[#allocation2 + $0x38] sm:$0xff] }
  0xf1   :  { %944 = vmatprep.subr.mxu0 %v337_v40  ;;  %1014 = vmatpush2.msra.mxu1 %v480_v41  ;;  %v424_v40 = vld [vmem:[#allocation4 + $0xa30] sm:$0xff]  ;;  %v421_v41 = vld [vmem:[#allocation4 + $0xa18] sm:$0xff] }
  0xf2   :  { %945 = vmatpush2.msra.mxu0 %v336_v42  ;;  %1015 = vmatprep.subr.mxu1 %v477_v43  ;;  %v485_v42 = vld [vmem:[#allocation4 + $0xc18] sm:$0xff]  ;;  %v1470_v43 = vld [vmem:[#allocation2 + $0x50] sm:$0xff] }
  0xf3   :  { %946 = vmatprep.subr.mxu0 %v333_v63  ;;  %1016 = vmatpush2.msra.mxu1 %v476_v44  ;;  %v420_v63 = vld [vmem:[#allocation4 + $0xa10] sm:$0xff]  ;;  %v1471_v44 = vld [vmem:[#allocation2 + $0x48] sm:$0xff] }
  0xf4   :  { %947 = vmatpush2.msra.mxu0 %v332_v45  ;;  %1017 = vmatprep.subr.mxu1 %v473_v2  ;;  %v484_v45 = vld [vmem:[#allocation4 + $0xc10] sm:$0xff]  ;;  %v1174_v2 = vld [vmem:[#allocation7 + $0xf8] sm:$0xff] }
  0xf5   :  { %948 = vmatprep.subr.mxu0 %v329_v46  ;;  %1018 = vmatpush2.msra.mxu1 %v472_v47  ;;  %v1158_v46 = vld [vmem:[#allocation7 + $0x78] sm:$0xff]  ;;  %v1173_v47 = vld [vmem:[#allocation7 + $0xf0] sm:$0xff] }
  0xf6   :  { %949 = vmatpush2.msra.mxu0 %v328_v48  ;;  %1019 = vmatprep.subr.mxu1 %v469_v49  ;;  %v1472_v48 = vld [vmem:[#allocation2 + $0x30] sm:$0xff]  ;;  %v1157_v49 = vld [vmem:[#allocation7 + $0x70] sm:$0xff] }
  0xf7   :  { %950 = vmatprep.subr.mxu0 %v325_v50  ;;  %1020 = vmatpush2.msra.mxu1 %v468_v51  ;;  %v1172_v50 = vld [vmem:[#allocation7 + $0xe8] sm:$0xff]  ;;  %v1190_v51 = vld [vmem:[#allocation7 + $0x178] sm:$0xff] }
  0xf8   :  { %951 = vmatpush2.msra.mxu0 %v324_v52  ;;  %1021 = vmatprep.subr.mxu1 %v465_v53  ;;  %v1171_v52 = vld [vmem:[#allocation7 + $0xe0] sm:$0xff] }
  0xf9   :  { %952 = vmatprep.subr.mxu0 %v321_v54  ;;  %1022 = vmatpush2.msra.mxu1 %v464_v55  ;;  %v1155_v53 = vld [vmem:[#allocation7 + $0x60] sm:$0xff]  ;;  %v1189_v54 = vld [vmem:[#allocation7 + $0x170] sm:$0xff]  ;;  %v1204_v55 = vld [vmem:[#allocation7 + $0x1e8] sm:$0xff] }
  0xfa   :  { %953 = vmatpush2.msra.mxu0 %v320_v56  ;;  %1023 = vmatprep.subr.mxu1 %v461_v57  ;;  %v1188_v56 = vld [vmem:[#allocation7 + $0x168] sm:$0xff]  ;;  %v1169_v57 = vld [vmem:[#allocation7 + $0xd0] sm:$0xff] }
  0xfb   :  { %954 = vmatprep.subr.mxu0 %v317_v58  ;;  %1024 = vmatpush2.msra.mxu1 %v460_v59  ;;  %v1203_v58 = vld [vmem:[#allocation7 + $0x1e0] sm:$0xff]  ;;  %v1153_v59 = vld [vmem:[#allocation7 + $0x50] sm:$0xff] }
  0xfc   :  { %955 = vmatpush2.msra.mxu0 %v316_v60  ;;  %1025 = vmatprep.subr.mxu1 %v457_v61  ;;  %v1187_v60 = vld [vmem:[#allocation7 + $0x160] sm:$0xff]  ;;  %v1202_v61 = vld [vmem:[#allocation7 + $0x1d8] sm:$0xff] }
  0xfd   :  { %956 = vmatprep.subr.mxu0 %v313_v62  ;;  %1026 = vmatpush2.msra.mxu1 %v456_v0  ;;  %v1152_v62 = vld [vmem:[#allocation7 + $0x48] sm:$0xff]  ;;  %v1186_v0 = vld [vmem:[#allocation7 + $0x158] sm:$0xff] }
  0xfe   :  { %957 = vmatpush2.msra.mxu0 %v312_v1  ;;  %1027 = vmatprep.subr.mxu1 %v453_v3  ;;  %v1167_v1 = vld [vmem:[#allocation7 + $0xc0] sm:$0xff]  ;;  %v1201_v3 = vld [vmem:[#allocation7 + $0x1d0] sm:$0xff] }
  0xff   :  { %958 = vmatprep.subr.mxu0 %v309_v4  ;;  %1028 = vmatpush2.msra.mxu1 %v452_v5  ;;  %v1151_v4 = vld [vmem:[#allocation7 + $0x40] sm:$0xff]  ;;  %v1185_v5 = vld [vmem:[#allocation7 + $0x150] sm:$0xff] }
 0x100   :  { %959 = vmatpush2.msra.mxu0 %v308_v6  ;;  %1029 = vmatprep.subr.mxu1 %v449_v7  ;;  %v1166_v6 = vld [vmem:[#allocation7 + $0xb8] sm:$0xff]  ;;  %v1200_v7 = vld [vmem:[#allocation7 + $0x1c8] sm:$0xff] }
 0x101   :  { %960 = vmatprep.subr.mxu0 %v305_v8  ;;  %1030 = vmatpush2.msra.mxu1 %v448_v9  ;;  %v1150_v8 = vld [vmem:[#allocation7 + $0x38] sm:$0xff]  ;;  %v1184_v9 = vld [vmem:[#allocation7 + $0x148] sm:$0xff] }
 0x102   :  { %961 = vmatpush2.msra.mxu0 %v304_v10  ;;  %1031 = vmatprep.subr.mxu1 %v445_v12  ;;  %v1165_v10 = vld [vmem:[#allocation7 + $0xb0] sm:$0xff]  ;;  %v1199_v12 = vld [vmem:[#allocation7 + $0x1c0] sm:$0xff] }
 0x103   :  { %962 = vmatprep.subr.mxu0 %v301_v14  ;;  %1032 = vmatpush2.msra.mxu1 %v444_v15  ;;  %v1149_v14 = vld [vmem:[#allocation7 + $0x30] sm:$0xff]  ;;  %v1164_v15 = vld [vmem:[#allocation7 + $0xa8] sm:$0xff] }
 0x104   :  { %963 = vmatpush2.msra.mxu0 %v300_v16  ;;  %1033 = vmatprep.subr.mxu1 %v441_v17  ;;  %v1148_v16 = vld [vmem:[#allocation7 + $0x28] sm:$0xff]  ;;  %v1163_v17 = vld [vmem:[#allocation7 + $0xa0] sm:$0xff] }
 0x105   :  { %964 = vmatprep.subr.mxu0 %v297_v18  ;;  %1034 = vmatpush2.msra.mxu1 %v440_v19  ;;  %v1147_v18 = vld [vmem:[#allocation7 + $0x20] sm:$0xff]  ;;  %v1162_v19 = vld [vmem:[#allocation7 + $0x98] sm:$0xff] }
 0x106   :  { %965 = vmatpush2.msra.mxu0 %v296_v22  ;;  %1035 = vmatprep.subr.mxu1 %v437_v24  ;;  %v1146_v22 = vld [vmem:[#allocation7 + $0x18] sm:$0xff]  ;;  %v1161_v24 = vld [vmem:[#allocation7 + $0x90] sm:$0xff] }
 0x107   :  { %966 = vmatprep.subr.mxu0 %v293_v26  ;;  %1036 = vmatpush2.msra.mxu1 %v436_v27  ;;  %v1145_v26 = vld [vmem:[#allocation7 + $0x10] sm:$0xff]  ;;  %v1160_v27 = vld [vmem:[#allocation7 + $0x88] sm:$0xff] }
 0x108   :  { %967 = vmatpush2.msra.mxu0 %v292_v28  ;;  %968 = vmatprep.mubr.f32.mxu0 %v1466_v32  ;;  %v1144_v28 = vld [vmem:[#allocation7 + $0x8] sm:$0xff]  ;;  %v1198_v32 = vld [vmem:[#allocation7 + $0x1b8] sm:$0xff] }
 0x109   :  { %1037 = vmatprep.subr.mxu1 %v433_v29  ;;  %969 = vmatmul.mubr.f32.vlgmr.msra.gmra.mxu0 %v1467_v34  ;;  %v1159_v29 = vld [vmem:[#allocation7 + $0x80] sm:$0xff]  ;;  %v1197_v34 = vld [vmem:[#allocation7 + $0x1b0] sm:$0xff] }
 0x10a   :  { %1038 = vmatpush2.msra.mxu1 %v432_v30  ;;  %897 = vmatprep.mubr.f32.mxu1 %v1468_v37  ;;  %v1143_v30 = vld [vmem:[#allocation7] sm:$0xff]  ;;  %v1180_v37 = vld [vmem:[#allocation7 + $0x128] sm:$0xff] }
 0x10b   :  { %1039 = vmatprep.subr.mxu1 %v429_v31  ;;  %1086 = vmatprep.subr.mxu0 %v489_v33  ;;  %v1183_v31 = vld [vmem:[#allocation7 + $0x140] sm:$0xff]  ;;  %v1182_v33 = vld [vmem:[#allocation7 + $0x138] sm:$0xff] }
 0x10c   :  { %898 = vmatmul.mubr.f32.gmra.mxu1 %v1469_v39  ;;  %1087 = vmatpush1.msra.mxu0 %v488_v36  ;;  %v1196_v36 = vld [vmem:[#allocation7 + $0x1a8] sm:$0xff]  ;;  %v1179_v39 = vld [vmem:[#allocation7 + $0x120] sm:$0xff] }
 0x10d   :  { %1040 = vmatpush2.msra.mxu1 %v428_v35  ;;  %974 = vmatprep.mubr.f32.mxu0 %v1470_v43  ;;  %v1181_v35 = vld [vmem:[#allocation7 + $0x130] sm:$0xff] }
 0x10e   :  { %1041 = vmatprep.subr.mxu1 %v425_v38  ;;  %975 = vmatmul.mubr.f32.gmra.mxu0 %v1471_v44  ;;  %v1195_v38 = vld [vmem:[#allocation7 + $0x1a0] sm:$0xff]  ;;  %v1177_v43 = vld [vmem:[#allocation7 + $0x110] sm:$0xff]  ;;  %v1176_v44 = vld [vmem:[#allocation7 + $0x108] sm:$0xff] }
 0x10f   :  { %1042 = vmatpush2.msra.mxu1 %v424_v40  ;;  %1088 = vmatprep.subr.mxu0 %v485_v42  ;;  %v1194_v40 = vld [vmem:[#allocation7 + $0x198] sm:$0xff]  ;;  %v1193_v42 = vld [vmem:[#allocation7 + $0x190] sm:$0xff] }
 0x110   :  { %1043 = vmatprep.subr.mxu1 %v421_v41  ;;  %1045 = vmatprep.mubr.f32.mxu1 %v1644_v11  ;;  %v1156_v11 = vld [vmem:[#allocation7 + $0x68] sm:$0xff]  ;;  %v1178_v41 = vld [vmem:[#allocation7 + $0x118] sm:$0xff] }
 0x111   :  { %1044 = vmatpush2.msra.mxu1 %v420_v63  ;;  %1089 = vmatpush1.msra.mxu0 %v484_v45  ;;  %v1192_v63 = vld [vmem:[#allocation7 + $0x188] sm:$0xff]  ;;  %v1191_v45 = vld [vmem:[#allocation7 + $0x180] sm:$0xff] }
 0x112   :  { %1046 = vmatmul.mubr.f32.vlgmr.msra.gmra.mxu1 %v1646_v13  ;;  %1122 = vmatprep.mubr.f32.mxu0 %v1590_v23  ;;  %v1206_v13 = vld [vmem:[#allocation7 + $0x1f8] sm:$0xff] }
 0x113   :  { %1051 = vmatprep.mubr.f32.mxu1 %v1650_v20  ;;  %1375 = vmatmul.mubr.msk.f32.vlgmr.msra.gmra.mxu0 %vm512_vm0, %v1472_v48  ;;  %v1205_v20 = vld [vmem:[#allocation7 + $0x1f0] sm:$0xff] }
 0x114   :  { %1378 = vmatprep.subr.mxu0 %v1174_v2  ;;  %1128 = vmatprep.mubr.f32.mxu0 %v1590_v23  ;;  %v1170_v23 = vld [vmem:[#allocation7 + $0xd8] sm:$0xff]  ;;  %v1175_v2 = vld [vmem:[#allocation7 + $0x100] sm:$0xff] }
 0x115   :  { %1379 = vmatpush3.msra.mxu0 %v1158_v46  ;;  %1416 = vmatprep.subr.mxu1 %v1206_v13  ;;  %v492_v46 = vlaneseq }
 0x116   :  { %1052 = vmatmul.mubr.f32.gmra.mxu1 %v1655_v25  ;;  %1380 = vmatprep.subr.mxu0 %v1173_v47  ;;  %v1154_v25 = vld [vmem:[#allocation7 + $0x58] sm:$0xff] }
 0x117   :  { %1381 = vmatpush3.msra.mxu0 %v1157_v49  ;;  %1417 = vmatpush3.msra.mxu1 %v1190_v51  ;;  %v493_v47 = vshrl.u32 %v492_v46, 7 }
 0x118   :  { %1376 = vmatmul.mubr.msk.f32.gmra.mxu0 %vm512_vm0, %v1652_v21  ;;  %1382 = vmatprep.subr.mxu0 %v1172_v50  ;;  %v1168_v21 = vld [vmem:[#allocation7 + $0xc8] sm:$0xff] }
 0x119   :  { %1383 = vmatpush3.msra.mxu0 %v1156_v11  ;;  %1418 = vmatprep.subr.mxu1 %v1205_v20  ;;  %v494_v50 = vsub.s32 0, %v493_v47  ;;  %v490_v11 = vld [vmem:[#allocation6] sm:$0xf]  ;;  %v498_v51 = vsub.s32 1, %v493_v47 }
 0x11a   :  { %1384 = vmatprep.subr.mxu0 %v1171_v52  ;;  %1419 = vmatpush3.msra.mxu1 %v1189_v54 }
 0x11b   :  { %1385 = vmatpush3.msra.mxu0 %v1155_v53  ;;  %1420 = vmatprep.subr.mxu1 %v1204_v55  ;;  %v495_v20 = vrot.slane %v490_v11, %v494_v50  ;;  %v499_v54 = vrot.slane %v490_v11, %v498_v51 }
 0x11c   :  { %1386 = vmatprep.subr.mxu0 %v1170_v23  ;;  %1421 = vmatpush3.msra.mxu1 %v1188_v56 }
 0x11d   :  { %1387 = vmatpush3.msra.mxu0 %v1154_v25  ;;  %1422 = vmatprep.subr.mxu1 %v1203_v58 }
 0x11e   :  { %1388 = vmatprep.subr.mxu0 %v1169_v57  ;;  %1423 = vmatpush3.msra.mxu1 %v1187_v60 }
 0x11f   :  { %1389 = vmatpush3.msra.mxu0 %v1153_v59  ;;  %1424 = vmatprep.subr.mxu1 %v1202_v61 }
 0x120   :  { %1390 = vmatprep.subr.mxu0 %v1168_v21  ;;  %1425 = vmatpush3.msra.mxu1 %v1186_v0 }
 0x121   :  { %1391 = vmatpush3.msra.mxu0 %v1152_v62  ;;  %1426 = vmatprep.subr.mxu1 %v1201_v3 }
 0x122   :  { %1392 = vmatprep.subr.mxu0 %v1167_v1  ;;  %1427 = vmatpush3.msra.mxu1 %v1185_v5 }
 0x123   :  { %1393 = vmatpush3.msra.mxu0 %v1151_v4  ;;  %1428 = vmatprep.subr.mxu1 %v1200_v7 }
 0x124   :  { %1394 = vmatprep.subr.mxu0 %v1166_v6  ;;  %1429 = vmatpush3.msra.mxu1 %v1184_v9 }
 0x125   :  { %1395 = vmatpush3.msra.mxu0 %v1150_v8  ;;  %1430 = vmatprep.subr.mxu1 %v1199_v12 }
 0x126   :  { %1396 = vmatprep.subr.mxu0 %v1165_v10  ;;  %1431 = vmatpush3.msra.mxu1 %v1183_v31 }
 0x127   :  { %1397 = vmatpush3.msra.mxu0 %v1149_v14  ;;  %1432 = vmatprep.subr.mxu1 %v1198_v32 }
 0x128   :  { %1398 = vmatprep.subr.mxu0 %v1164_v15  ;;  %1433 = vmatpush3.msra.mxu1 %v1182_v33 }
 0x129   :  { %1399 = vmatpush3.msra.mxu0 %v1148_v16  ;;  %1434 = vmatprep.subr.mxu1 %v1197_v34 }
 0x12a   :  { %1400 = vmatprep.subr.mxu0 %v1163_v17  ;;  %1435 = vmatpush3.msra.mxu1 %v1181_v35 }
 0x12b   :  { %1401 = vmatpush3.msra.mxu0 %v1147_v18  ;;  %1436 = vmatprep.subr.mxu1 %v1196_v36 }
 0x12c   :  { %1402 = vmatprep.subr.mxu0 %v1162_v19  ;;  %1437 = vmatpush3.msra.mxu1 %v1180_v37 }
 0x12d   :  { %1403 = vmatpush3.msra.mxu0 %v1146_v22  ;;  %1438 = vmatprep.subr.mxu1 %v1195_v38 }
 0x12e   :  { %1404 = vmatprep.subr.mxu0 %v1161_v24  ;;  %1439 = vmatpush3.msra.mxu1 %v1179_v39 }
 0x12f   :  { %1405 = vmatpush3.msra.mxu0 %v1145_v26  ;;  %1440 = vmatprep.subr.mxu1 %v1194_v40 }
 0x130   :  { %1406 = vmatprep.subr.mxu0 %v1160_v27  ;;  %1441 = vmatpush3.msra.mxu1 %v1178_v41 }
 0x131   :  { %1407 = vmatpush3.msra.mxu0 %v1144_v28  ;;  %1442 = vmatprep.subr.mxu1 %v1193_v42  ;;  %v502_v28 = vsub.s32 2, %v493_v47 }
 0x132   :  { %1408 = vmatprep.subr.mxu0 %v1159_v29  ;;  %1443 = vmatpush3.msra.mxu1 %v1177_v43  ;;  %v506_v29 = vsub.s32 3, %v493_v47 }
 0x133   :  { %1409 = vmatpush3.msra.mxu0 %v1143_v30  ;;  %1444 = vmatprep.subr.mxu1 %v1192_v63  ;;  %v503_v32 = vrot.slane %v490_v11, %v502_v28 }
 0x134   :  { %1445 = vmatpush3.msra.mxu1 %v1176_v44  ;;  %v507_v35 = vrot.slane %v490_v11, %v506_v29 }
 0x135   :  { %1446 = vmatprep.subr.mxu1 %v1191_v45 }
 0x136   :  { %1447 = vmatpush3.msra.mxu1 %v1175_v2 }
 0x142   :  { %v585_v49 = vpop.f32.mrf.mxu0 }
 0x143   :  { %v662_v48 = vpop.f32.mrf.mxu1  ;;  %v586_v55 = vadd.f32 %v585_v49, %v495_v20 }
 0x144   :  { %v587_v52 = vpop.f32.mrf.mxu0 }
 0x145   :  { %v664_v13 = vpop.f32.mrf.mxu1  ;;  %v588_v56 = vadd.f32 %v587_v52, %v499_v54  ;;  %v663_v58 = vadd.f32 %v662_v48, %v586_v55 }
 0x147   :  { %v668_v53 = vpop.f32.mrf.mxu1  ;;  %v665_v21 = vadd.f32 %v664_v13, %v588_v56 }
 0x148   :  { %v591_v23 = vpop.f32.mrf.mxu0 }
 0x149   :  { %v670_v25 = vpop.f32.mrf.mxu1  ;;  %v592_v61 = vadd.f32 %v591_v23, %v495_v20 }
 0x14a   :  { %v593_v57 = vpop.f32.mrf.mxu0 }
 0x14b   :  { %v594_v1 = vadd.f32 %v593_v57, %v499_v54  ;;  %v669_v6 = vadd.f32 %v668_v53, %v592_v61 }
 0x14d   :  { %v816_v59 = vpop.f32.mrf.mxu1  ;;  %v671_v10 = vadd.f32 %v670_v25, %v594_v1 }
 0x14f   :  { %v818_v4 = vpop.f32.mrf.mxu1 }
 0x185   :  { %v739_v60 = vpop.f32.mrf.mxu0 }
 0x186   :  { %v740_v62 = vadd.f32 %v739_v60, %v663_v58 }
 0x187   :  { %v741_v0 = vpop.f32.mrf.mxu0 }
 0x188   :  { %v742_v3 = vadd.f32 %v741_v0, %v665_v21  ;;  %v817_v5 = vadd.f32 %v816_v59, %v740_v62  ;;  %v1377_v0 = vld [vmem:[#allocation9] ss:$0 sm:$0xff] }
 0x18a   :  { %v819_v7 = vadd.f32 %v818_v4, %v742_v3  ;;  %v822_v8 = vpop.f32.mrf.mxu1  ;;  %v1135_v15 = vmax.f32 %v817_v5, 0.0 }
 0x18c   :  { %v745_v9 = vpop.f32.mrf.mxu0  ;;  %v1136_v12 = vmax.f32 %v819_v7, 0.0  ;;  %v824_v19 = vpop.f32.mrf.mxu1 }
 0x18d   :  { %v746_v14 = vadd.f32 %v745_v9, %v669_v6 }
 0x18e   :  { %v747_v16 = vpop.f32.mrf.mxu0  ;;  %1278 = vmatprep.mubr.f32.mxu0 %v1136_v12 }
 0x18f   :  { %v748_v17 = vadd.f32 %v747_v16, %v671_v10  ;;  %v823_v18 = vadd.f32 %v822_v8, %v746_v14  ;;  %1279 = vmatmul.mubr.f32.vlgmr.msra.gmra.mxu0 %v1135_v15  ;;  %v893_v27 = vpop.f32.mrf.mxu1 }
 0x190   :  { %v894_v36 = vadd.f32 %v893_v27, %v503_v32 }
 0x191   :  { %v825_v22 = vadd.f32 %v824_v19, %v748_v17  ;;  %v1139_v26 = vmax.f32 %v823_v18, 0.0  ;;  %v895_v30 = vpop.f32.mrf.mxu1 }
 0x192   :  { %v896_v39 = vadd.f32 %v895_v30, %v507_v35 }
 0x193   :  { %v1140_v24 = vmax.f32 %v825_v22, 0.0 }
 0x195   :  { %1283 = vmatprep.mubr.f32.mxu0 %v1140_v24 }
 0x196   :  { %1284 = vmatmul.mubr.f32.gmra.mxu0 %v1139_v26 }
 0x1c9   :  { %v970_v31 = vpop.f32.mrf.mxu0 }
 0x1ca   :  { %v971_v40 = vadd.f32 %v970_v31, %v894_v36 }
 0x1cb   :  { %v972_v34 = vpop.f32.mrf.mxu0 }
 0x1cc   :  { %v899_v33 = vpop.f32.mrf.mxu1  ;;  %v973_v63 = vadd.f32 %v972_v34, %v896_v39 }
 0x1cd   :  { %v900_v41 = vadd.f32 %v899_v33, %v503_v32 }
 0x1ce   :  { %v976_v37 = vpop.f32.mrf.mxu0  ;;  %v901_v38 = vpop.f32.mrf.mxu1 }
 0x1cf   :  { %v902_v44 = vadd.f32 %v901_v38, %v507_v35  ;;  %v977_v47 = vadd.f32 %v976_v37, %v900_v41 }
 0x1d0   :  { %v978_v42 = vpop.f32.mrf.mxu0 }
 0x1d1   :  { %v979_v51 = vadd.f32 %v978_v42, %v902_v44 }
 0x1d2   :  { %v1047_v43 = vpop.f32.mrf.mxu1 }
 0x1d3   :  { %v1048_v45 = vadd.f32 %v1047_v43, %v971_v40  ;;  %v1124_v2 = vpop.f32.mrf.mxu0 }
 0x1d4   :  { %v1049_v46 = vpop.f32.mrf.mxu1 }
 0x1d5   :  { %v1050_v48 = vadd.f32 %v1049_v46, %v973_v63  ;;  %v1125_v49 = vadd.f32 %v1124_v2, %v1048_v45  ;;  %v1126_v50 = vpop.f32.mrf.mxu0 }
 0x1d6   :  { %v1053_v13 = vpop.f32.mrf.mxu1 }
 0x1d7   :  { %v1127_v11 = vadd.f32 %v1126_v50, %v1050_v48  ;;  %v1054_v52 = vadd.f32 %v1053_v13, %v977_v47  ;;  %v1137_v55 = vmax.f32 %v1125_v49, 0.0 }
 0x1d8   :  { %v1130_v20 = vpop.f32.mrf.mxu0  ;;  %v1055_v53 = vpop.f32.mrf.mxu1 }
 0x1d9   :  { %v1138_v54 = vmax.f32 %v1127_v11, 0.0  ;;  %v1056_v23 = vadd.f32 %v1055_v53, %v979_v51  ;;  %v1131_v25 = vadd.f32 %v1130_v20, %v1054_v52 }
 0x1da   :  { %v1132_v56 = vpop.f32.mrf.mxu0 }
 0x1db   :  { %v1133_v57 = vadd.f32 %v1132_v56, %v1056_v23  ;;  %1353 = vmatprep.mubr.f32.mxu1 %v1138_v54  ;;  %v1141_v59 = vmax.f32 %v1131_v25, 0.0 }
 0x1dc   :  { %1354 = vmatmul.mubr.f32.vlgmr.msra.gmra.mxu1 %v1137_v55 }
 0x1dd   :  { %v1142_v58 = vmax.f32 %v1133_v57, 0.0 }
 0x1df   :  { %1358 = vmatprep.mubr.f32.mxu1 %v1142_v58 }
 0x1e0   :  { %1359 = vmatmul.mubr.f32.gmra.mxu1 %v1141_v59 }
 0x24f   :  { %v1410_v60 = vpop.f32.mrf.mxu0 }
 0x251   :  { %v1411_v21 = vpop.f32.mrf.mxu0 }
 0x252   :  { %v1412_v62 = vadd.f32 %v1411_v21, %v1410_v60 }
 0x254   :  { %v1281_v5 = vadd.f32 %v1412_v62, %v1377_v0 }
 0x256   :  { %v1413_v61 = vpop.f32.mrf.mxu0 }
 0x258   :  { %v1414_v1 = vpop.f32.mrf.mxu0 }
 0x259   :  { %v1415_v6 = vadd.f32 %v1414_v1, %v1413_v61 }
 0x25b   :  { %v1286_v12 = vadd.f32 %v1415_v6, %v1377_v0 }
 0x29c   :  { %v1448_v3 = vpop.f32.mrf.mxu1 }
 0x29e   :  { %v1449_v4 = vpop.f32.mrf.mxu1 }
 0x29f   :  { %v1450_v7 = vadd.f32 %v1449_v4, %v1448_v3 }
 0x2a0   :  { %v1451_v8 = vpop.f32.mrf.mxu1 }
 0x2a1   :  { %v1356_v9 = vadd.f32 %v1450_v7, %v1281_v5 }
 0x2a2   :  { %v1452_v10 = vpop.f32.mrf.mxu1 }
 0x2a3   :  { %1364 = vst [vmem:[%s1683_s5] sm:$0xff] %v1356_v9  ;;  %v1453_v14 = vadd.f32 %v1452_v10, %v1451_v8 }
 0x2a5   :  { %v1361_v15 = vadd.f32 %v1453_v14, %v1286_v12 }
 0x2a7   :  { %1365 = vst [vmem:[%s1683_s5 + $0x8] sm:$0xff] %v1361_v15 }
 0x2a8   :  { %1370 = vsyncpa [#allocation3], 1 }
 0x2a9   :  { %1371 = vsyncpa [#allocation5], 1 }
 0x2aa   :  { %1372 = vsyncpa [#allocation8], 1 }

</bundles_post_ra>
